<compile_context>
chip_gen: v6e
topology: v6e:2x2x1
jax: 0.10.0
libtpu: 0.0.40
codegen_flags: <defaults>
</compile_context>

<pallas_src>
import math

import numpy as np
import jax
import jax.numpy as jnp
from jax.experimental import pallas as pl
from jax.experimental.pallas import tpu as pltpu


# ----------------------------------------------------------------------------
# Pallas kernel: weight-stationary fused matmul + bias + ReLU
#   block:  acc(t_out, t_pix) += W(t_out, t_k) @ X(t_k, t_pix)
# ----------------------------------------------------------------------------
def _ws_matmul_bias_relu_kernel(w_ref, x_ref, b_ref, o_ref, acc_ref):
    k = pl.program_id(3)

    @pl.when(k == 0)
    def _():
        acc_ref[...] = jnp.zeros_like(acc_ref)

    acc_ref[...] += jnp.dot(w_ref[...], x_ref[...],
                            preferred_element_type=jnp.float32)

    @pl.when(k == pl.num_programs(3) - 1)
    def _():
        o_ref[...] = jnp.maximum(acc_ref[...] + b_ref[...], 0.0).astype(
            o_ref.dtype)


def _pick_tile(dim, multiple, max_tile):
    """Largest t <= max_tile that is a multiple of `multiple` and divides dim."""
    t = (min(max_tile, dim) // multiple) * multiple
    while t >= multiple:
        if dim % t == 0:
            return t
        t -= multiple
    return None


def conv1x1_bias_relu_pallas(x, w, b, *, max_pix_tile=512, max_out_tile=1024,
                             max_k_tile=2048):
    """Fused y[n] = relu(w @ x[n] + b), weight-stationary, NCHW-friendly.

    x: (N, K, P)  activations, P = H*W (lane axis)
    w: (O, K)     torch-layout 1x1-conv weight
    b: (O,)       bias
    returns: (N, O, P) float32
    """
    n, k_dim, p_dim = x.shape
    o_dim, k_w = w.shape
    assert k_w == k_dim and b.shape == (o_dim,)

    x = x.astype(jnp.bfloat16)            # MXU-native operands, f32 accumulate
    w = w.astype(jnp.bfloat16)
    b = b.astype(jnp.float32)

    # --- tile selection: prefer tiles that divide exactly (no pad copies) ---
    t_pix = _pick_tile(p_dim, 128, max_pix_tile)
    p_pad = p_dim
    if t_pix is None:                     # rare fallback: pad pixels to 128
        p_pad = pl.cdiv(p_dim, 128) * 128
        x = jnp.pad(x, ((0, 0), (0, 0), (0, p_pad - p_dim)))
        t_pix = _pick_tile(p_pad, 128, max_pix_tile)

    t_out = _pick_tile(o_dim, 8, max_out_tile)
    o_pad = o_dim
    if t_out is None:                     # rare fallback: pad out-channels to 8
        o_pad = pl.cdiv(o_dim, 8) * 8
        w = jnp.pad(w, ((0, o_pad - o_dim), (0, 0)))
        b = jnp.pad(b, (0, o_pad - o_dim))
        t_out = _pick_tile(o_pad, 8, max_out_tile)

    if k_dim > max_k_tile and k_dim % 128 == 0:
        t_k = _pick_tile(k_dim, 128, max_k_tile) or k_dim
    else:
        t_k = k_dim                       # small / irregular K: one full-K block
    n_k = k_dim // t_k

    grid = (n, o_pad // t_out, p_pad // t_pix, n_k)
    b2 = b.reshape(o_pad, 1)

    # explicit VMEM budget (double-buffered tiles + accumulator), sized so the
    # defaults stay safe on v7x's 64 MiB physical VMEM.
    tile_bytes = (2 * (t_out * t_k * 2 + t_k * t_pix * 2 + t_out * 4
                       + t_out * t_pix * 4)
                  + t_out * t_pix * 4)
    vmem_limit = int(min(tile_bytes + (8 << 20), 48 << 20))

    out = pl.pallas_call(
        _ws_matmul_bias_relu_kernel,
        out_shape=jax.ShapeDtypeStruct((n, o_pad, p_pad), jnp.float32),
        grid=grid,
        in_specs=[
            pl.BlockSpec((t_out, t_k), lambda bb, i, j, kk: (i, kk)),       # W
            pl.BlockSpec((None, t_k, t_pix),
                         lambda bb, i, j, kk: (bb, kk, j)),                  # X
            pl.BlockSpec((t_out, 1), lambda bb, i, j, kk: (i, 0)),           # bias
        ],
        out_specs=pl.BlockSpec((None, t_out, t_pix),
                               lambda bb, i, j, kk: (bb, i, j)),
        scratch_shapes=[pltpu.VMEM((t_out, t_pix), jnp.float32)],
        compiler_params=pltpu.CompilerParams(
            dimension_semantics=("parallel", "parallel", "parallel",
                                 "arbitrary"),
            vmem_limit_bytes=vmem_limit),
    )(w, x, b2)

    if o_pad != o_dim or p_pad != p_dim:
        out = out[:, :o_dim, :p_dim]
    return out


# ----------------------------------------------------------------------------
# Pooling / upsampling expressed as fixed linear operators (host-built, tiny)
# ----------------------------------------------------------------------------
def _adaptive_pool_matrix(in_h, in_w, out_h, out_w):
    """(out_h*out_w, in_h*in_w) matrix matching torch AdaptiveAvgPool2d bins."""
    mat = np.zeros((out_h * out_w, in_h * in_w), np.float32)
    for i in range(out_h):
        h0 = (i * in_h) // out_h
        h1 = math.ceil((i + 1) * in_h / out_h)
        for j in range(out_w):
            w0 = (j * in_w) // out_w
            w1 = math.ceil((j + 1) * in_w / out_w)
            inv_area = 1.0 / ((h1 - h0) * (w1 - w0))
            for hh in range(h0, h1):
                for ww in range(w0, w1):
                    mat[i * out_w + j, hh * in_w + ww] = inv_area
    return mat


def _bilinear_upsample_matrix(in_h, in_w, out_h, out_w):
    """(out_h*out_w, in_h*in_w) bilinear interp matrix, align_corners=False."""
    mat = np.zeros((out_h * out_w, in_h * in_w), np.float32)

    def src(o, osz, isz):
        s = max((o + 0.5) * (isz / osz) - 0.5, 0.0)
        i0 = min(int(math.floor(s)), isz - 1)
        i1 = min(i0 + 1, isz - 1)
        return i0, i1, s - i0

    for y in range(out_h):
        y0, y1, fy = src(y, out_h, in_h)
        for x in range(out_w):
            x0, x1, fx = src(x, out_w, in_w)
            row = y * out_w + x
            mat[row, y0 * in_w + x0] += (1 - fy) * (1 - fx)
            mat[row, y0 * in_w + x1] += (1 - fy) * fx
            mat[row, y1 * in_w + x0] += fy * (1 - fx)
            mat[row, y1 * in_w + x1] += fy * fx
    return mat


# ----------------------------------------------------------------------------
# PSPModule forward
# ----------------------------------------------------------------------------
def psp_module_init(key, features, out_features=1024, sizes=(1, 2, 3, 6)):
    keys = jax.random.split(key, len(sizes) + 2)
    stage_weights = [
        0.1 * jax.random.normal(keys[i], (features, features), jnp.float32)
        for i in range(len(sizes))
    ]  # per-stage 1x1 conv weights (out_c, in_c), no bias
    in_bottle = features * (len(sizes) + 1)
    bottleneck_w = 0.1 * jax.random.normal(
        keys[len(sizes)], (out_features, in_bottle), jnp.float32)   # torch (out,in)
    bottleneck_b = 0.1 * jax.random.normal(
        keys[len(sizes) + 1], (out_features,), jnp.float32)
    return {
        "stage_weights": stage_weights,
        "bottleneck_w": bottleneck_w,
        "bottleneck_b": bottleneck_b,
        "sizes": tuple(sizes),
    }


def _build_pyramid_concat(feats, params):
    """feats (N,C,H,W) -> concatenated pyramid features (N, (len(sizes)+1)*C, H*W)."""
    n, c, h, w = feats.shape
    hw = h * w
    feats_pix = feats.reshape(n, c, hw)          # stay NCHW, spatial flattened
    priors = []
    for size, w_stage in zip(params["sizes"], params["stage_weights"]):
        pool_m = jnp.asarray(_adaptive_pool_matrix(h, w, size, size))   # (s*s, HW)
        up_m = jnp.asarray(_bilinear_upsample_matrix(size, size, h, w))  # (HW, s*s)
        pooled = jnp.einsum("ncq,pq->ncp", feats_pix, pool_m)   # adaptive avg pool
        mixed = jnp.einsum("dc,ncp->ndp", w_stage, pooled)      # stage 1x1 conv
        priors.append(jnp.einsum("ndp,qp->ndq", mixed, up_m))   # bilinear upsample
    priors.append(feats_pix)
    return jnp.concatenate(priors, axis=1)       # (N, 5C, H*W), NCHW layout


def psp_module_forward(feats, params):
    n, _, h, w = feats.shape
    cat = _build_pyramid_concat(feats, params)                       # (N, K, HW)
    out = conv1x1_bias_relu_pallas(cat, params["bottleneck_w"],
                                   params["bottleneck_b"])           # (N, O, HW)
    return out.reshape(n, -1, h, w)                                  # NCHW


if __name__ == "__main__":
    key = jax.random.PRNGKey(0)
    k_in, k_par = jax.random.split(key)

    N, C, H, W = 2, 4, 16, 16
    OUT_FEATURES = 1024

    feats = jax.random.normal(k_in, (N, C, H, W), jnp.float32)
    params = psp_module_init(k_par, features=C, out_features=OUT_FEATURES,
                             sizes=(1, 2, 3, 6))

    out = psp_module_forward(feats, params)
    out = jax.block_until_ready(out)
    assert out.shape == (N, OUT_FEATURES, H, W)
    assert bool(jnp.all(out >= 0.0))             # ReLU

    # f32 reference of the bottleneck (kernel uses bf16 operands, f32 accum)
    cat = _build_pyramid_concat(feats, params)
    ref = jnp.maximum(
        jnp.einsum("ok,nkp->nop", params["bottleneck_w"], cat)
        + params["bottleneck_b"][None, :, None], 0.0
    ).reshape(N, OUT_FEATURES, H, W)
    max_err = float(jnp.max(jnp.abs(out - ref)))
    assert max_err < 5e-2, max_err

    print("KERNEL_OK")
</pallas_src>

<mosaic_0001>
module attributes {stable_mosaic.version = 11 : i64} {
  func.func @_ws_matmul_bias_relu_kernel(%arg0: i32, %arg1: i32, %arg2: i32, %arg3: i32, %arg4: memref<1024x20xbf16, #tpu.memory_space<vmem>>, %arg5: memref<1x20x256xbf16, #tpu.memory_space<vmem>>, %arg6: memref<1024x1xf32, #tpu.memory_space<vmem>>, %arg7: memref<1x1024x256xf32, #tpu.memory_space<vmem>>, %arg8: memref<1024x256xf32, #tpu.memory_space<vmem>>) attributes {dimension_semantics = [#tpu.dimension_semantics<parallel>, #tpu.dimension_semantics<parallel>, #tpu.dimension_semantics<parallel>, #tpu.dimension_semantics<arbitrary>], iteration_bounds = array<i64: 2, 1, 1, 1>, scalar_prefetch = 0 : i64, scratch_operands = 1 : i64, tpu.core_type = #tpu.core_type<tc>, window_params = [{transform_indices = @transform_0, window_bounds = array<i64: 1024, 20>}, {transform_indices = @transform_1, window_bounds = array<i64: 1, 20, 256>}, {transform_indices = @transform_2, window_bounds = array<i64: 1024, 1>}, {transform_indices = @transform_3, window_bounds = array<i64: 1, 1024, 256>}]} {
    %c0_i32 = arith.constant 0 : i32
    %0 = arith.cmpi eq, %arg3, %c0_i32 : i32
    %1 = arith.extui %0 : i1 to i32
    %c0_i32_0 = arith.constant 0 : i32
    %2 = arith.cmpi ne, %1, %c0_i32_0 : i32
    scf.if %2 {
      %cst_11 = arith.constant 0.000000e+00 : f32
      %13 = vector.broadcast %cst_11 : f32 to vector<1024x256xf32>
      %c0_12 = arith.constant 0 : index
      %c0_13 = arith.constant 0 : index
      %14 = vector.load %arg8[%c0_12, %c0_13] : memref<1024x256xf32, #tpu.memory_space<vmem>>, vector<1024x256xf32>
      tpu.vector_store %arg8[%c0_12, %c0_13], %13 {strides = array<i32>} : memref<1024x256xf32, #tpu.memory_space<vmem>>, vector<1024x256xf32>,
    } else {
    }
    %c0 = arith.constant 0 : index
    %c0_1 = arith.constant 0 : index
    %3 = vector.load %arg8[%c0, %c0_1] : memref<1024x256xf32, #tpu.memory_space<vmem>>, vector<1024x256xf32>
    %c0_2 = arith.constant 0 : index
    %c0_3 = arith.constant 0 : index
    %4 = vector.load %arg4[%c0_2, %c0_3] : memref<1024x20xbf16, #tpu.memory_space<vmem>>, vector<1024x20xbf16>
    %c0_4 = arith.constant 0 : index
    %c0_5 = arith.constant 0 : index
    %c0_6 = arith.constant 0 : index
    %5 = vector.load %arg5[%c0_4, %c0_5, %c0_6] : memref<1x20x256xbf16, #tpu.memory_space<vmem>>, vector<1x20x256xbf16>
    %6 = vector.shape_cast %5 : vector<1x20x256xbf16> to vector<20x256xbf16>
    %cst = arith.constant dense<0.000000e+00> : vector<1024x256xf32>
    %7 = tpu.matmul %4, %6, %cst {dimension_numbers = #tpu.dot_dimension_numbers<[1], [0], [0], [1], [0, 0, 1, 1], [], []>} : vector<1024x20xbf16>, vector<20x256xbf16>, vector<1024x256xf32> -> vector<1024x256xf32>
    %8 = arith.addf %3, %7 : vector<1024x256xf32>
    %c0_7 = arith.constant 0 : index
    %c0_8 = arith.constant 0 : index
    %9 = vector.load %arg8[%c0_7, %c0_8] : memref<1024x256xf32, #tpu.memory_space<vmem>>, vector<1024x256xf32>
    tpu.vector_store %arg8[%c0_7, %c0_8], %8 {strides = array<i32>} : memref<1024x256xf32, #tpu.memory_space<vmem>>, vector<1024x256xf32>,
    %c0_i32_9 = arith.constant 0 : i32
    %10 = arith.cmpi eq, %arg3, %c0_i32_9 : i32
    %11 = arith.extui %10 : i1 to i32
    %c0_i32_10 = arith.constant 0 : i32
    %12 = arith.cmpi ne, %11, %c0_i32_10 : i32
    scf.if %12 {
      %c0_11 = arith.constant 0 : index
      %c0_12 = arith.constant 0 : index
      %13 = vector.load %arg8[%c0_11, %c0_12] : memref<1024x256xf32, #tpu.memory_space<vmem>>, vector<1024x256xf32>
      %c0_13 = arith.constant 0 : index
      %c0_14 = arith.constant 0 : index
      %14 = vector.load %arg6[%c0_13, %c0_14] : memref<1024x1xf32, #tpu.memory_space<vmem>>, vector<1024x1xf32>
      %15 = vector.broadcast %14 : vector<1024x1xf32> to vector<1024x256xf32>
      %16 = arith.addf %13, %15 : vector<1024x256xf32>
      %cst_15 = arith.constant 0.000000e+00 : f32
      %17 = vector.broadcast %cst_15 : f32 to vector<1024x256xf32>
      %18 = arith.maximumf %16, %17 : vector<1024x256xf32>
      %c0_16 = arith.constant 0 : index
      %c0_17 = arith.constant 0 : index
      %c0_18 = arith.constant 0 : index
      %19 = vector.load %arg7[%c0_16, %c0_17, %c0_18] : memref<1x1024x256xf32, #tpu.memory_space<vmem>>, vector<1x1024x256xf32>
      %20 = vector.shape_cast %19 : vector<1x1024x256xf32> to vector<1024x256xf32>
      %21 = vector.shape_cast %18 : vector<1024x256xf32> to vector<1x1024x256xf32>
      tpu.vector_store %arg7[%c0_16, %c0_17, %c0_18], %21 {strides = array<i32>} : memref<1x1024x256xf32, #tpu.memory_space<vmem>>, vector<1x1024x256xf32>,
    } else {
    }
    return
  }
  func.func @transform_0(%arg0: i32, %arg1: i32, %arg2: i32, %arg3: i32) -> (i32, i32) {
    %c0_i32 = arith.constant 0 : i32
    return %arg1, %arg3 : i32, i32
  }
  func.func @transform_1(%arg0: i32, %arg1: i32, %arg2: i32, %arg3: i32) -> (i32, i32, i32) {
    %c0_i32 = arith.constant 0 : i32
    return %arg0, %arg3, %arg2 : i32, i32, i32
  }
  func.func @transform_2(%arg0: i32, %arg1: i32, %arg2: i32, %arg3: i32) -> (i32, i32) {
    %c0_i32 = arith.constant 0 : i32
    %c0_i32_0 = arith.constant 0 : i32
    return %arg1, %c0_i32 : i32, i32
  }
  func.func @transform_3(%arg0: i32, %arg1: i32, %arg2: i32, %arg3: i32) -> (i32, i32, i32) {
    %c0_i32 = arith.constant 0 : i32
    return %arg0, %arg1, %arg2 : i32, i32, i32
  }
}

</mosaic_0001>

<bundles_post_ra>
// kernel: tpu_custom_call.1
= control target key start
LH: loop header
LB: loop body
LE: loop exit
PB: predicated region body
PF: predicated region fallthrough
CT: control target
= control target key end

     0   :  { %8 = vsyncpa [#allocation4], 0  ;;  %s6418_s0 = inlined_call_operand.vmem [shape: bf16[1024,20], index: 0, kind: input, shape index: {}]   ;;  %s6419_s1 = inlined_call_operand.vmem [shape: bf16[2,20,256], index: 1, kind: input, shape index: {}]   ;;  %s6420_s2 = inlined_call_operand.vmem [shape: f32[1024,1], index: 2, kind: input, shape index: {}]   ;;  %s6421_s3 = inlined_call_operand.hbm [shape: f32[2,1024,256], index: 3, kind: output, shape index: {}]  }
   0x1   :  { %10 = vsyncpa [#allocation4 + $0x1], 0  ;;  %s4983_s12 = smov 0   ;;  %s4985_s13 = smov 0  }
   0x2   :  { %s4987_s14 = smov 0   ;;  %s4989_s15 = smov 0  }
   0x3   :  { %s4991_s16 = smov 0   ;;  %s4993_s17 = smov 0  }
   0x4 LB: > { %s4599_s18 = sadd.s32 4294967295, %s4957_s17   ;;  %s4600_s19 = sadd.s32 4294967294, %s4957_s17   ;;  %s4957_s17 = sphi %s4993_s17, %s16_s17   ;;  %s4953_s16 = sphi %s4991_s16, %s6515_s16   ;;  %s4949_s15 = sphi %s4989_s15, %s6514_s15   ;;  %s4945_s14 = sphi %s4987_s14, %s6513_s14   ;;  %s4941_s13 = sphi %s4985_s13, %s6512_s13   ;;  %s4937_s12 = sphi %s4983_s12, %s6511_s12  }
   0x5   : > { %s42_s20 = sadd.s32 1, %s4953_s16  ;;  %s137_s21 = sadd.s32 1, %s4945_s14 }
   0x6   : > { %p44_p0 = scmp.ge.s32.totalorder %s42_s20, 2  ;;  %p147_p1 = scmp.ne.s32.totalorder %s4945_s14, %s4941_s13 }
   0x7   : > { %p148_p2 = scmp.eq.s32.totalorder %s4599_s18, 1  ;;  %p153_p3 = scmp.ne.s32.totalorder %s4941_s13, %s4937_s12 }
   0x8   : > { %s6517_s20 = smov (%p44_p0, %s42_s20), 0  ;;  %p154_p5 = scmp.eq.s32.totalorder %s4600_s19, 1 }
   0x9   : > { %p5023_p4 = por %p148_p2, %p147_p1  ;;  %s130_s23 = ssub.s32 %s4953_s16, %s6517_s20 }
   0xa   : > { %p4605_p6 = scmp.ge.s32.totalorder %s4957_s17, 1  ;;  %p135_p7 = scmp.eq.s32.totalorder %s130_s23, 0 }
   0xb   : > { %p5030_p8 = por %p154_p5, %p153_p3  ;;  %p212_p9 = scmp.lt.s32.totalorder %s4957_s17, 3 }
   0xc   : > { %s5036_s25 = scalar_select %p135_p7, %s4945_s14, %s137_s21  }
   0xd   : > { %p213_p10 = pnand %p4605_p6, %p212_p9 }
   0xf   : > { %216 = sbr.rel (%p213_p10) target bundleno = 505 (0x1f9), region = 32 }
  0x14   : > { %v2920_v0 = vld [vmem:[%s6420_s2 + $0x10] sm:$0xff]  ;;  %v2918_v1 = vld [vmem:[%s6420_s2] sm:$0xff]  ;;  %p269_p11 = scmp.lt.s32.totalorder %s4949_s15, 1  ;;  %v6422_v2 = vmov 0   ;;  %v2921_v3 = vld [vmem:[%s6420_s2 + $0x18] sm:$0xff]  ;;  %vm1467_vm0 = vcmask 1041408  }
  0x15   : > { %4811 = vset.pattern.permute.xlu1 %v6422_v2  ;;  %4810 = vset.pattern.permute.xlu0 %v6422_v2  ;;  %v2919_v4 = vld [vmem:[%s6420_s2 + $0x8] sm:$0xff]  ;;  %v2922_v6 = vld [vmem:[%s6420_s2 + $0x20] sm:$0xff]  ;;  %v2925_v12 = vld [vmem:[%s6420_s2 + $0x38] sm:$0xff]  ;;  %vm1274_vm1 = vcmask 162816   ;;  %s255_s6 = sand.u32 1, %s4941_s13   ;;  %s4746_s9 = sshll.u32 %s4949_s15, 15 }
  0x16   : > { %3058 = vperm.xlu1 %4811, %v2920_v0   ;;  %3048 = vperm.xlu0 %4810, %v2918_v1   ;;  %s270_s5 = scalar_select %p269_p11, %s4949_s15, 1  ;;  %v2923_v5 = vld [vmem:[%s6420_s2 + $0x28] sm:$0xff]  ;;  %v2924_v13 = vld [vmem:[%s6420_s2 + $0x30] sm:$0xff]  ;;  %v2926_v16 = vld [vmem:[%s6420_s2 + $0x40] sm:$0xff] }
  0x17   : > { %1506 = vmatprep.mubr.bf16.mxu0 %v6422_v2  ;;  %1826 = vmatprep.mubr.bf16.mxu1 %v6422_v2  ;;  %v2927_v15 = vld [vmem:[%s6420_s2 + $0x48] sm:$0xff]  ;;  %v4817_v17 = vld [vmem:[%s6418_s0] sm:$0xff]   ;;  %v2929_v19 = vld [vmem:[%s6420_s2 + $0x58] sm:$0xff]  ;;  %s4606_s11 = sshll.u32 %s255_s6, 11  ;;  %s6364_s19 = scalar_lea.hbm %s6421_s3, %s4746_s9 }
  0x18   : > { %s4751_s8 = smul.u32 24, %s270_s5  ;;  %v4818_v18 = vld [vmem:[%s6418_s0 + $0x100] sm:$0xff]   ;;  %v2928_v20 = vld [vmem:[%s6420_s2 + $0x50] sm:$0xff]  ;;  %v2931_v21 = vld [vmem:[%s6420_s2 + $0x68] sm:$0xff]  ;;  %s6373_s15 = scalar_lea.sflag [#allocation4], %s255_s6 }
  0x19   : > { %v2930_v22 = vld [vmem:[%s6420_s2 + $0x60] sm:$0xff]  ;;  %v4819_v23 = vld [vmem:[%s6418_s0 + $0x8] sm:$0xff]   ;;  %v2933_v25 = vld [vmem:[%s6420_s2 + $0x78] sm:$0xff] }
  0x1a   : > { %3063 = vperm.xlu1 %4811, %v2921_v3   ;;  %3053 = vperm.xlu0 %4810, %v2919_v4   ;;  %s280_s23 = scalar_lea.vmem %s6419_s1, %s4751_s8  ;;  %v4820_v24 = vld [vmem:[%s6418_s0 + $0x108] sm:$0xff]   ;;  %v2932_v26 = vld [vmem:[%s6420_s2 + $0x70] sm:$0xff]  ;;  %v2934_v28 = vld [vmem:[%s6420_s2 + $0x80] sm:$0xff]  ;;  %s5736_s8 = scalar_lea.vmem [#allocation3], %s4606_s11 }
  0x1b   : > { %v938_v7 = vld [vmem:[%s280_s23 + $0x10] sm:$0x33]  ;;  %v4814_v10 = vld [vmem:[%s280_s23 + $0x4] ss:$8 sps:$4 sm:$0xff]   ;;  %v4816_v14 = vld [vmem:[%s280_s23] ss:$8 sps:$4 sm:$0xff]  }
  0x1c   : > { %v4675_v8 = vcombine.high %v938_v7, %v938_v7  ;;  %v4674_v9 = vcombine.low %v938_v7, %v938_v7  ;;  %v2935_v27 = vld [vmem:[%s6420_s2 + $0x88] sm:$0xff]  ;;  %v4821_v29 = vld [vmem:[%s6418_s0 + $0x10] sm:$0xff]   ;;  %v2937_v31 = vld [vmem:[%s6420_s2 + $0x98] sm:$0xff]  ;;  %s4473_s10 = sshll.u32 %s5736_s8, 4  ;;  %s4960_s23 = smov [#allocation3]   ;;  %s6366_s10 = int_to_ptr.vmem [resolvable:$true] %s4473_s10 }
  0x1d   : > { %v4822_v30 = vld [vmem:[%s6418_s0 + $0x110] sm:$0xff]   ;;  %v2939_v33 = vld [vmem:[%s6420_s2 + $0xa8] sm:$0xff]  ;;  %v2938_v34 = vld [vmem:[%s6420_s2 + $0xa0] sm:$0xff]  ;;  %s4881_s21 = scalar_lea.vmem %s6366_s10, 32768  ;;  %s4885_s26 = sshll.u32 %s4960_s23, 4  ;;  %s4886_s26 = int_to_ptr.vmem [resolvable:$false] %s4885_s26 }
  0x1e   : > { %3073 = vperm.xlu1 %4811, %v2923_v5   ;;  %3068 = vperm.xlu0 %4810, %v2922_v6   ;;  %v1469_v11 = vsel %vm1467_vm0, %v4674_v9, 0  ;;  %v2936_v32 = vld [vmem:[%s6420_s2 + $0x90] sm:$0xff]  ;;  %v4823_v35 = vld [vmem:[%s6418_s0 + $0x18] sm:$0xff]   ;;  %v2943_v39 = vld [vmem:[%s6420_s2 + $0xc8] sm:$0xff]  ;;  %p4882_p12 = scmp.ne.s32.totalorder %s6366_s10, %s4881_s21  ;;  %s4887_s27 = scalar_lea.vmem %s4886_s26, 65536 }
  0x1f   : > { %4676 = vmatprep.subr.msk.bf16.mxu0 %vm1467_vm0, %v4675_v8  ;;  %4747 = vmatprep.subr.msk.bf16.mxu1 %vm1467_vm0, %v4675_v8  ;;  %v4824_v36 = vld [vmem:[%s6418_s0 + $0x118] sm:$0xff]   ;;  %v2940_v38 = vld [vmem:[%s6420_s2 + $0xb0] sm:$0xff]  ;;  %v2942_v40 = vld [vmem:[%s6420_s2 + $0xc0] sm:$0xff]  ;;  %p4888_p1 = scmp.lt.s32.totalorder %s6366_s10, %s4886_s26  ;;  %p4889_p2 = scmp.lt.s32.totalorder %s4887_s27, %s4881_s21 }
  0x20   : > { %1487 = vmatpush1.bf16.msra.mxu0 %v1469_v11  ;;  %4749 = vmatpush1.bf16.msra.mxu1 %v1469_v11  ;;  %v2941_v37 = vld [vmem:[%s6420_s2 + $0xb8] sm:$0xff]  ;;  %v4825_v41 = vld [vmem:[%s6418_s0 + $0x20] sm:$0xff]   ;;  %v2944_v44 = vld [vmem:[%s6420_s2 + $0xd0] sm:$0xff]  ;;  %p4883_p13 = pnand %p4882_p12, %p5023_p4 }
  0x21   : > { %1488 = vmatprep.subr.bf16.mxu0 %v4814_v10  ;;  %4748 = vmatprep.subr.bf16.mxu1 %v4814_v10  ;;  %v4826_v42 = vld [vmem:[%s6418_s0 + $0x120] sm:$0xff]   ;;  %v2945_v43 = vld [vmem:[%s6420_s2 + $0xd8] sm:$0xff]  ;;  %v2947_v45 = vld [vmem:[%s6420_s2 + $0xe8] sm:$0xff]  ;;  %p4890_p3 = por %p4889_p2, %p4888_p1 }
  0x22   : > { %3083 = vperm.xlu1 %4811, %v2925_v12   ;;  %3078 = vperm.xlu0 %4810, %v2924_v13   ;;  %v2946_v46 = vld [vmem:[%s6420_s2 + $0xe0] sm:$0xff]  ;;  %v4827_v47 = vld [vmem:[%s6418_s0 + $0x28] sm:$0xff]   ;;  %v2949_v49 = vld [vmem:[%s6420_s2 + $0xf8] sm:$0xff]  ;;  %p4884_p0 = pneg %p4883_p13 }
  0x23   : > { %v4828_v48 = vld [vmem:[%s6418_s0 + $0x128] sm:$0xff]   ;;  %v2948_v50 = vld [vmem:[%s6420_s2 + $0xf0] sm:$0xff]  ;;  %v2950_v52 = vld [vmem:[%s6420_s2 + $0x100] sm:$0xff] }
  0x24   : > { %1489 = vmatpush1.bf16.msra.mxu0 %v4816_v14  ;;  %4750 = vmatpush1.bf16.msra.mxu1 %v4816_v14  ;;  %v2951_v51 = vld [vmem:[%s6420_s2 + $0x108] sm:$0xff]  ;;  %v4829_v53 = vld [vmem:[%s6418_s0 + $0x30] sm:$0xff]   ;;  %v2953_v55 = vld [vmem:[%s6420_s2 + $0x118] sm:$0xff]  ;;  %p4891_p5 = pnand %p4890_p3, %p4884_p0 }
  0x25   : > { %v4830_v54 = vld [vmem:[%s6418_s0 + $0x130] sm:$0xff]   ;;  %v2955_v57 = vld [vmem:[%s6420_s2 + $0x128] sm:$0xff]  ;;  %v2954_v58 = vld [vmem:[%s6420_s2 + $0x120] sm:$0xff] }
  0x26   : > { %3093 = vperm.xlu1 %4811, %v2927_v15   ;;  %3088 = vperm.xlu0 %4810, %v2926_v16   ;;  %v2952_v56 = vld [vmem:[%s6420_s2 + $0x110] sm:$0xff]  ;;  %v4831_v59 = vld [vmem:[%s6418_s0 + $0x38] sm:$0xff]   ;;  %v2959_v63 = vld [vmem:[%s6420_s2 + $0x148] sm:$0xff] }
  0x27   : > { %4677 = vmatmul.mubr.msk.bf16.vlgmr.msra.gmra.mxu0 %vm1274_vm1, %v4817_v17  ;;  %4709 = vmatmul.mubr.msk.bf16.vlgmr.msra.gmra.mxu1 %vm1274_vm1, %v4818_v18  ;;  %v4832_v60 = vld [vmem:[%s6418_s0 + $0x138] sm:$0xff]   ;;  %v2956_v62 = vld [vmem:[%s6420_s2 + $0x130] sm:$0xff]  ;;  %v2958_v0 = vld [vmem:[%s6420_s2 + $0x140] sm:$0xff] }
  0x28   : > { %1516 = vmatprep.mubr.bf16.mxu0 %v6422_v2  ;;  %1836 = vmatprep.mubr.bf16.mxu1 %v6422_v2  ;;  %v2957_v61 = vld [vmem:[%s6420_s2 + $0x138] sm:$0xff]  ;;  %v4833_v1 = vld [vmem:[%s6418_s0 + $0x40] sm:$0xff]   ;;  %v2960_v5 = vld [vmem:[%s6420_s2 + $0x150] sm:$0xff] }
  0x29   : > { %v4834_v3 = vld [vmem:[%s6418_s0 + $0x140] sm:$0xff]   ;;  %v2961_v4 = vld [vmem:[%s6420_s2 + $0x158] sm:$0xff]  ;;  %v2963_v6 = vld [vmem:[%s6420_s2 + $0x168] sm:$0xff] }
  0x2a   : > { %3103 = vperm.xlu1 %4811, %v2929_v19   ;;  %3098 = vperm.xlu0 %4810, %v2928_v20   ;;  %v2962_v7 = vld [vmem:[%s6420_s2 + $0x160] sm:$0xff]  ;;  %v4835_v8 = vld [vmem:[%s6418_s0 + $0x48] sm:$0xff]   ;;  %v2965_v10 = vld [vmem:[%s6420_s2 + $0x178] sm:$0xff] }
  0x2b   : > { %v4836_v9 = vld [vmem:[%s6418_s0 + $0x148] sm:$0xff]   ;;  %v2964_v11 = vld [vmem:[%s6420_s2 + $0x170] sm:$0xff]  ;;  %v2966_v13 = vld [vmem:[%s6420_s2 + $0x180] sm:$0xff] }
  0x2c   : > { %v2967_v12 = vld [vmem:[%s6420_s2 + $0x188] sm:$0xff]  ;;  %v4837_v14 = vld [vmem:[%s6418_s0 + $0x50] sm:$0xff]   ;;  %v2969_v16 = vld [vmem:[%s6420_s2 + $0x198] sm:$0xff] }
  0x2d   : > { %v4838_v15 = vld [vmem:[%s6418_s0 + $0x150] sm:$0xff]   ;;  %v2971_v18 = vld [vmem:[%s6420_s2 + $0x1a8] sm:$0xff]  ;;  %v2970_v19 = vld [vmem:[%s6420_s2 + $0x1a0] sm:$0xff] }
  0x2e   : > { %3113 = vperm.xlu1 %4811, %v2931_v21   ;;  %3108 = vperm.xlu0 %4810, %v2930_v22   ;;  %v2968_v17 = vld [vmem:[%s6420_s2 + $0x190] sm:$0xff]  ;;  %v4839_v20 = vld [vmem:[%s6418_s0 + $0x58] sm:$0xff]  }
  0x2f   : > { %4678 = vmatmul.mubr.msk.bf16.gmra.mxu0 %vm1274_vm1, %v4819_v23  ;;  %4710 = vmatmul.mubr.msk.bf16.gmra.mxu1 %vm1274_vm1, %v4820_v24  ;;  %v4840_v21 = vld [vmem:[%s6418_s0 + $0x158] sm:$0xff]   ;;  %v2972_v23 = vld [vmem:[%s6420_s2 + $0x1b0] sm:$0xff]  ;;  %v2975_v24 = vld [vmem:[%s6420_s2 + $0x1c8] sm:$0xff] }
  0x30   : > { %1526 = vmatprep.mubr.bf16.mxu0 %v6422_v2  ;;  %1846 = vmatprep.mubr.bf16.mxu1 %v6422_v2  ;;  %v2973_v22 = vld [vmem:[%s6420_s2 + $0x1b8] sm:$0xff] }
  0x32   : > { %3123 = vperm.xlu1 %4811, %v2933_v25   ;;  %3118 = vperm.xlu0 %4810, %v2932_v26   ;;  %v2974_v25 = vld [vmem:[%s6420_s2 + $0x1c0] sm:$0xff] }
  0x33   : > { %v4841_v26 = vld [vmem:[%s6418_s0 + $0x60] sm:$0xff]  }
  0x36   : > { %3133 = vperm.xlu1 %4811, %v2935_v27   ;;  %3128 = vperm.xlu0 %4810, %v2934_v28   ;;  %v4842_v27 = vld [vmem:[%s6418_s0 + $0x160] sm:$0xff]   ;;  %v2977_v28 = vld [vmem:[%s6420_s2 + $0x1d8] sm:$0xff] }
  0x37   : > { %4679 = vmatmul.mubr.msk.bf16.gmra.mxu0 %vm1274_vm1, %v4821_v29  ;;  %4711 = vmatmul.mubr.msk.bf16.gmra.mxu1 %vm1274_vm1, %v4822_v30  ;;  %v2976_v29 = vld [vmem:[%s6420_s2 + $0x1d0] sm:$0xff]  ;;  %v2979_v30 = vld [vmem:[%s6420_s2 + $0x1e8] sm:$0xff] }
  0x38   : > { %1536 = vmatprep.mubr.bf16.mxu0 %v6422_v2  ;;  %1856 = vmatprep.mubr.bf16.mxu1 %v6422_v2 }
  0x3a   : > { %3143 = vperm.xlu1 %4811, %v2937_v31   ;;  %3138 = vperm.xlu0 %4810, %v2936_v32   ;;  %v2978_v31 = vld [vmem:[%s6420_s2 + $0x1e0] sm:$0xff]  ;;  %v4843_v32 = vld [vmem:[%s6418_s0 + $0x68] sm:$0xff]  }
  0x3e   : > { %3153 = vperm.xlu1 %4811, %v2939_v33   ;;  %3148 = vperm.xlu0 %4810, %v2938_v34   ;;  %v4844_v33 = vld [vmem:[%s6418_s0 + $0x168] sm:$0xff]   ;;  %v2981_v34 = vld [vmem:[%s6420_s2 + $0x1f8] sm:$0xff] }
  0x3f   : > { %4680 = vmatmul.mubr.msk.bf16.gmra.mxu0 %vm1274_vm1, %v4823_v35  ;;  %4712 = vmatmul.mubr.msk.bf16.gmra.mxu1 %vm1274_vm1, %v4824_v36  ;;  %v2980_v35 = vld [vmem:[%s6420_s2 + $0x1f0] sm:$0xff] }
  0x40   : > { %1546 = vmatprep.mubr.bf16.mxu0 %v6422_v2  ;;  %1866 = vmatprep.mubr.bf16.mxu1 %v6422_v2 }
  0x42   : > { %3163 = vperm.xlu1 %4811, %v2941_v37   ;;  %3158 = vperm.xlu0 %4810, %v2940_v38   ;;  %v2983_v38 = vld [vmem:[%s6420_s2 + $0x208] sm:$0xff] }
  0x46   : > { %3173 = vperm.xlu1 %4811, %v2943_v39   ;;  %3168 = vperm.xlu0 %4810, %v2942_v40   ;;  %v2982_v39 = vld [vmem:[%s6420_s2 + $0x200] sm:$0xff]  ;;  %v4845_v40 = vld [vmem:[%s6418_s0 + $0x70] sm:$0xff]  }
  0x47   : > { %4681 = vmatmul.mubr.msk.bf16.gmra.mxu0 %vm1274_vm1, %v4825_v41  ;;  %4713 = vmatmul.mubr.msk.bf16.gmra.mxu1 %vm1274_vm1, %v4826_v42  ;;  %v4846_v41 = vld [vmem:[%s6418_s0 + $0x170] sm:$0xff]  }
  0x48   : > { %1556 = vmatprep.mubr.bf16.mxu0 %v6422_v2  ;;  %1876 = vmatprep.mubr.bf16.mxu1 %v6422_v2 }
  0x4a   : > { %3183 = vperm.xlu1 %4811, %v2945_v43   ;;  %3178 = vperm.xlu0 %4810, %v2944_v44   ;;  %v2985_v44 = vld [vmem:[%s6420_s2 + $0x218] sm:$0xff] }
  0x4e   : > { %3193 = vperm.xlu1 %4811, %v2947_v45   ;;  %3188 = vperm.xlu0 %4810, %v2946_v46   ;;  %v2984_v45 = vld [vmem:[%s6420_s2 + $0x210] sm:$0xff] }
  0x4f   : > { %4682 = vmatmul.mubr.msk.bf16.gmra.mxu0 %vm1274_vm1, %v4827_v47  ;;  %4714 = vmatmul.mubr.msk.bf16.gmra.mxu1 %vm1274_vm1, %v4828_v48  ;;  %v2987_v48 = vld [vmem:[%s6420_s2 + $0x228] sm:$0xff] }
  0x50   : > { %1566 = vmatprep.mubr.bf16.mxu0 %v6422_v2  ;;  %1886 = vmatprep.mubr.bf16.mxu1 %v6422_v2 }
  0x52   : > { %3203 = vperm.xlu1 %4811, %v2949_v49   ;;  %3198 = vperm.xlu0 %4810, %v2948_v50   ;;  %v2986_v49 = vld [vmem:[%s6420_s2 + $0x220] sm:$0xff]  ;;  %v4847_v50 = vld [vmem:[%s6418_s0 + $0x78] sm:$0xff]  }
  0x56   : > { %3213 = vperm.xlu1 %4811, %v2951_v51   ;;  %3208 = vperm.xlu0 %4810, %v2950_v52   ;;  %v4848_v51 = vld [vmem:[%s6418_s0 + $0x178] sm:$0xff]  }
  0x57   : > { %4683 = vmatmul.mubr.msk.bf16.gmra.mxu0 %vm1274_vm1, %v4829_v53  ;;  %4715 = vmatmul.mubr.msk.bf16.gmra.mxu1 %vm1274_vm1, %v4830_v54  ;;  %v2989_v54 = vld [vmem:[%s6420_s2 + $0x238] sm:$0xff] }
  0x58   : > { %1576 = vmatprep.mubr.bf16.mxu0 %v6422_v2  ;;  %1896 = vmatprep.mubr.bf16.mxu1 %v6422_v2 }
  0x5a   : > { %3223 = vperm.xlu1 %4811, %v2953_v55   ;;  %3218 = vperm.xlu0 %4810, %v2952_v56   ;;  %v2988_v55 = vld [vmem:[%s6420_s2 + $0x230] sm:$0xff] }
  0x5e   : > { %3233 = vperm.xlu1 %4811, %v2955_v57   ;;  %3228 = vperm.xlu0 %4810, %v2954_v58   ;;  %v2991_v58 = vld [vmem:[%s6420_s2 + $0x248] sm:$0xff] }
  0x5f   : > { %4684 = vmatmul.mubr.msk.bf16.gmra.mxu0 %vm1274_vm1, %v4831_v59  ;;  %4716 = vmatmul.mubr.msk.bf16.gmra.mxu1 %vm1274_vm1, %v4832_v60  ;;  %v2990_v59 = vld [vmem:[%s6420_s2 + $0x240] sm:$0xff] }
  0x60   : > { %1586 = vmatprep.mubr.bf16.mxu0 %v6422_v2  ;;  %1906 = vmatprep.mubr.bf16.mxu1 %v6422_v2  ;;  %v4849_v60 = vld [vmem:[%s6418_s0 + $0x80] sm:$0xff]  }
  0x62   : > { %3243 = vperm.xlu1 %4811, %v2957_v61   ;;  %3238 = vperm.xlu0 %4810, %v2956_v62   ;;  %v4850_v61 = vld [vmem:[%s6418_s0 + $0x180] sm:$0xff]  }
  0x66   : > { %3253 = vperm.xlu1 %4811, %v2959_v63   ;;  %3248 = vperm.xlu0 %4810, %v2958_v0   ;;  %v2993_v0 = vld [vmem:[%s6420_s2 + $0x258] sm:$0xff] }
  0x67   : > { %4685 = vmatmul.mubr.msk.bf16.gmra.mxu0 %vm1274_vm1, %v4833_v1  ;;  %4717 = vmatmul.mubr.msk.bf16.gmra.mxu1 %vm1274_vm1, %v4834_v3  ;;  %v2992_v1 = vld [vmem:[%s6420_s2 + $0x250] sm:$0xff] }
  0x68   : > { %1596 = vmatprep.mubr.bf16.mxu0 %v6422_v2  ;;  %1916 = vmatprep.mubr.bf16.mxu1 %v6422_v2 }
  0x6a   : > { %3263 = vperm.xlu1 %4811, %v2961_v4   ;;  %3258 = vperm.xlu0 %4810, %v2960_v5   ;;  %v2995_v5 = vld [vmem:[%s6420_s2 + $0x268] sm:$0xff] }
  0x6e   : > { %3273 = vperm.xlu1 %4811, %v2963_v6   ;;  %3268 = vperm.xlu0 %4810, %v2962_v7   ;;  %v2994_v6 = vld [vmem:[%s6420_s2 + $0x260] sm:$0xff]  ;;  %v4851_v7 = vld [vmem:[%s6418_s0 + $0x88] sm:$0xff]  }
  0x6f   : > { %4686 = vmatmul.mubr.msk.bf16.gmra.mxu0 %vm1274_vm1, %v4835_v8  ;;  %4718 = vmatmul.mubr.msk.bf16.gmra.mxu1 %vm1274_vm1, %v4836_v9  ;;  %v4852_v8 = vld [vmem:[%s6418_s0 + $0x188] sm:$0xff]  }
  0x70   : > { %1606 = vmatprep.mubr.bf16.mxu0 %v6422_v2  ;;  %1926 = vmatprep.mubr.bf16.mxu1 %v6422_v2 }
  0x72   : > { %3283 = vperm.xlu1 %4811, %v2965_v10   ;;  %3278 = vperm.xlu0 %4810, %v2964_v11   ;;  %v2997_v11 = vld [vmem:[%s6420_s2 + $0x278] sm:$0xff] }
  0x76   : > { %3293 = vperm.xlu1 %4811, %v2967_v12   ;;  %3288 = vperm.xlu0 %4810, %v2966_v13   ;;  %v2996_v12 = vld [vmem:[%s6420_s2 + $0x270] sm:$0xff] }
  0x77   : > { %4687 = vmatmul.mubr.msk.bf16.gmra.mxu0 %vm1274_vm1, %v4837_v14  ;;  %4719 = vmatmul.mubr.msk.bf16.gmra.mxu1 %vm1274_vm1, %v4838_v15  ;;  %v2999_v15 = vld [vmem:[%s6420_s2 + $0x288] sm:$0xff] }
  0x78   : > { %1616 = vmatprep.mubr.bf16.mxu0 %v6422_v2  ;;  %1936 = vmatprep.mubr.bf16.mxu1 %v6422_v2 }
  0x7a   : > { %3303 = vperm.xlu1 %4811, %v2969_v16   ;;  %3298 = vperm.xlu0 %4810, %v2968_v17   ;;  %v2998_v16 = vld [vmem:[%s6420_s2 + $0x280] sm:$0xff]  ;;  %v4853_v17 = vld [vmem:[%s6418_s0 + $0x90] sm:$0xff]  }
  0x7e   : > { %3313 = vperm.xlu1 %4811, %v2971_v18   ;;  %3308 = vperm.xlu0 %4810, %v2970_v19   ;;  %v4854_v18 = vld [vmem:[%s6418_s0 + $0x190] sm:$0xff]  }
  0x7f   : > { %4688 = vmatmul.mubr.msk.bf16.gmra.mxu0 %vm1274_vm1, %v4839_v20  ;;  %4720 = vmatmul.mubr.msk.bf16.gmra.mxu1 %vm1274_vm1, %v4840_v21  ;;  %v3001_v21 = vld [vmem:[%s6420_s2 + $0x298] sm:$0xff] }
  0x80   : > { %1626 = vmatprep.mubr.bf16.mxu0 %v6422_v2  ;;  %1946 = vmatprep.mubr.bf16.mxu1 %v6422_v2 }
  0x82   : > { %3323 = vperm.xlu1 %4811, %v2973_v22   ;;  %3318 = vperm.xlu0 %4810, %v2972_v23   ;;  %v3000_v22 = vld [vmem:[%s6420_s2 + $0x290] sm:$0xff] }
  0x86   : > { %3333 = vperm.xlu1 %4811, %v2975_v24   ;;  %3328 = vperm.xlu0 %4810, %v2974_v25   ;;  %v3003_v25 = vld [vmem:[%s6420_s2 + $0x2a8] sm:$0xff] }
  0x87   : > { %4689 = vmatmul.mubr.msk.bf16.gmra.mxu0 %vm1274_vm1, %v4841_v26  ;;  %4721 = vmatmul.mubr.msk.bf16.gmra.mxu1 %vm1274_vm1, %v4842_v27  ;;  %v3002_v26 = vld [vmem:[%s6420_s2 + $0x2a0] sm:$0xff]  ;;  %v4855_v27 = vld [vmem:[%s6418_s0 + $0x98] sm:$0xff]  }
  0x88   : > { %1636 = vmatprep.mubr.bf16.mxu0 %v6422_v2  ;;  %1956 = vmatprep.mubr.bf16.mxu1 %v6422_v2 }
  0x8a   : > { %3343 = vperm.xlu1 %4811, %v2977_v28   ;;  %3338 = vperm.xlu0 %4810, %v2976_v29   ;;  %v4856_v28 = vld [vmem:[%s6418_s0 + $0x198] sm:$0xff]  }
  0x8e   : > { %3353 = vperm.xlu1 %4811, %v2979_v30   ;;  %3348 = vperm.xlu0 %4810, %v2978_v31   ;;  %v3005_v31 = vld [vmem:[%s6420_s2 + $0x2b8] sm:$0xff] }
  0x8f   : > { %4690 = vmatmul.mubr.msk.bf16.gmra.mxu0 %vm1274_vm1, %v4843_v32  ;;  %4722 = vmatmul.mubr.msk.bf16.gmra.mxu1 %vm1274_vm1, %v4844_v33  ;;  %v3004_v32 = vld [vmem:[%s6420_s2 + $0x2b0] sm:$0xff] }
  0x90   : > { %1646 = vmatprep.mubr.bf16.mxu0 %v6422_v2  ;;  %1966 = vmatprep.mubr.bf16.mxu1 %v6422_v2 }
  0x91   : > { %v5379_v36 = vpop.permute.xlu1 %3058  ;;  %v5381_v37 = vpop.permute.xlu0 %3048 }
  0x92   : > { %3363 = vperm.xlu1 %4811, %v2981_v34   ;;  %3358 = vperm.xlu0 %4810, %v2980_v35   ;;  %v3007_v35 = vld [vmem:[%s6420_s2 + $0x2c8] sm:$0xff] }
  0x95   : > { %v5395_v42 = vpop.permute.xlu1 %3063  ;;  %v5397_v43 = vpop.permute.xlu0 %3053 }
  0x96   : > { %3373 = vperm.xlu1 %4811, %v2983_v38   ;;  %3368 = vperm.xlu0 %4810, %v2982_v39   ;;  %v3006_v38 = vld [vmem:[%s6420_s2 + $0x2c0] sm:$0xff] }
  0x97   : > { %4691 = vmatmul.mubr.msk.bf16.gmra.mxu0 %vm1274_vm1, %v4845_v40  ;;  %4723 = vmatmul.mubr.msk.bf16.gmra.mxu1 %vm1274_vm1, %v4846_v41  ;;  %v4857_v39 = vld [vmem:[%s6418_s0 + $0xa0] sm:$0xff]  }
  0x98   : > { %1656 = vmatprep.mubr.bf16.mxu0 %v6422_v2  ;;  %1976 = vmatprep.mubr.bf16.mxu1 %v6422_v2  ;;  %v4858_v40 = vld [vmem:[%s6418_s0 + $0x1a0] sm:$0xff]  }
  0x99   : > { %v5409_v46 = vpop.permute.xlu1 %3073  ;;  %v5411_v47 = vpop.permute.xlu0 %3068 }
  0x9a   : > { %3383 = vperm.xlu1 %4811, %v2985_v44   ;;  %3378 = vperm.xlu0 %4810, %v2984_v45   ;;  %v3009_v45 = vld [vmem:[%s6420_s2 + $0x2d8] sm:$0xff] }
  0x9d   : > { %v5425_v52 = vpop.permute.xlu1 %3083  ;;  %v5427_v53 = vpop.permute.xlu0 %3078 }
  0x9e   : > { %3393 = vperm.xlu1 %4811, %v2987_v48   ;;  %3388 = vperm.xlu0 %4810, %v2986_v49   ;;  %v3008_v48 = vld [vmem:[%s6420_s2 + $0x2d0] sm:$0xff] }
  0x9f   : > { %4692 = vmatmul.mubr.msk.bf16.gmra.mxu0 %vm1274_vm1, %v4847_v50  ;;  %4724 = vmatmul.mubr.msk.bf16.gmra.mxu1 %vm1274_vm1, %v4848_v51  ;;  %v3011_v51 = vld [vmem:[%s6420_s2 + $0x2e8] sm:$0xff] }
  0xa0   : > { %1666 = vmatprep.mubr.bf16.mxu0 %v6422_v2  ;;  %1986 = vmatprep.mubr.bf16.mxu1 %v6422_v2 }
  0xa1   : > { %v5439_v56 = vpop.permute.xlu1 %3093  ;;  %v5441_v57 = vpop.permute.xlu0 %3088 }
  0xa2   : > { %3403 = vperm.xlu1 %4811, %v2989_v54   ;;  %3398 = vperm.xlu0 %4810, %v2988_v55   ;;  %v3010_v54 = vld [vmem:[%s6420_s2 + $0x2e0] sm:$0xff]  ;;  %v4859_v55 = vld [vmem:[%s6418_s0 + $0xa8] sm:$0xff]  }
  0xa5   : > { %v5455_v62 = vpop.permute.xlu1 %3103  ;;  %v5457_v63 = vpop.permute.xlu0 %3098 }
  0xa6   : > { %3413 = vperm.xlu1 %4811, %v2991_v58   ;;  %3408 = vperm.xlu0 %4810, %v2990_v59   ;;  %v4860_v58 = vld [vmem:[%s6418_s0 + $0x1a8] sm:$0xff]  }
  0xa7   : > { %4693 = vmatmul.mubr.msk.bf16.gmra.mxu0 %vm1274_vm1, %v4849_v60  ;;  %4725 = vmatmul.mubr.msk.bf16.gmra.mxu1 %vm1274_vm1, %v4850_v61  ;;  %v3013_v61 = vld [vmem:[%s6420_s2 + $0x2f8] sm:$0xff] }
  0xa8   : > { %1676 = vmatprep.mubr.bf16.mxu0 %v6422_v2  ;;  %1996 = vmatprep.mubr.bf16.mxu1 %v6422_v2 }
  0xa9   : > { %v5469_v3 = vpop.permute.xlu1 %3113  ;;  %v5471_v4 = vpop.permute.xlu0 %3108 }
  0xaa   : > { %3423 = vperm.xlu1 %4811, %v2993_v0   ;;  %3418 = vperm.xlu0 %4810, %v2992_v1   ;;  %v3012_v0 = vld [vmem:[%s6420_s2 + $0x2f0] sm:$0xff] }
  0xad   : > { %v5485_v9 = vpop.permute.xlu1 %3123  ;;  %v5487_v10 = vpop.permute.xlu0 %3118 }
  0xae   : > { %3433 = vperm.xlu1 %4811, %v2995_v5   ;;  %3428 = vperm.xlu0 %4810, %v2994_v6   ;;  %v3015_v6 = vld [vmem:[%s6420_s2 + $0x308] sm:$0xff] }
  0xaf   : > { %4694 = vmatmul.mubr.msk.bf16.gmra.mxu0 %vm1274_vm1, %v4851_v7  ;;  %4726 = vmatmul.mubr.msk.bf16.gmra.mxu1 %vm1274_vm1, %v4852_v8  ;;  %v3014_v7 = vld [vmem:[%s6420_s2 + $0x300] sm:$0xff]  ;;  %v4861_v8 = vld [vmem:[%s6418_s0 + $0xb0] sm:$0xff]  }
  0xb0   : > { %1686 = vmatprep.mubr.bf16.mxu0 %v6422_v2  ;;  %2006 = vmatprep.mubr.bf16.mxu1 %v6422_v2 }
  0xb1   : > { %v5499_v13 = vpop.permute.xlu1 %3133  ;;  %v5501_v14 = vpop.permute.xlu0 %3128 }
  0xb2   : > { %3443 = vperm.xlu1 %4811, %v2997_v11   ;;  %3438 = vperm.xlu0 %4810, %v2996_v12   ;;  %v4862_v11 = vld [vmem:[%s6418_s0 + $0x1b0] sm:$0xff]  }
  0xb5   : > { %v5515_v19 = vpop.permute.xlu1 %3143  ;;  %v5517_v20 = vpop.permute.xlu0 %3138 }
  0xb6   : > { %3453 = vperm.xlu1 %4811, %v2999_v15   ;;  %3448 = vperm.xlu0 %4810, %v2998_v16   ;;  %v3017_v16 = vld [vmem:[%s6420_s2 + $0x318] sm:$0xff] }
  0xb7   : > { %4695 = vmatmul.mubr.msk.bf16.gmra.mxu0 %vm1274_vm1, %v4853_v17  ;;  %4727 = vmatmul.mubr.msk.bf16.gmra.mxu1 %vm1274_vm1, %v4854_v18  ;;  %v3016_v17 = vld [vmem:[%s6420_s2 + $0x310] sm:$0xff] }
  0xb8   : > { %1696 = vmatprep.mubr.bf16.mxu0 %v6422_v2  ;;  %2016 = vmatprep.mubr.bf16.mxu1 %v6422_v2 }
  0xb9   : > { %v5529_v23 = vpop.permute.xlu1 %3153  ;;  %v5531_v24 = vpop.permute.xlu0 %3148 }
  0xba   : > { %3463 = vperm.xlu1 %4811, %v3001_v21   ;;  %3458 = vperm.xlu0 %4810, %v3000_v22   ;;  %v3019_v22 = vld [vmem:[%s6420_s2 + $0x328] sm:$0xff] }
  0xbd   : > { %v5545_v29 = vpop.permute.xlu1 %3163  ;;  %v5547_v30 = vpop.permute.xlu0 %3158 }
  0xbe   : > { %3473 = vperm.xlu1 %4811, %v3003_v25   ;;  %3468 = vperm.xlu0 %4810, %v3002_v26   ;;  %v3018_v25 = vld [vmem:[%s6420_s2 + $0x320] sm:$0xff]  ;;  %v4863_v26 = vld [vmem:[%s6418_s0 + $0xb8] sm:$0xff]  }
  0xbf   : > { %4696 = vmatmul.mubr.msk.bf16.gmra.mxu0 %vm1274_vm1, %v4855_v27  ;;  %4728 = vmatmul.mubr.msk.bf16.gmra.mxu1 %vm1274_vm1, %v4856_v28  ;;  %v4864_v27 = vld [vmem:[%s6418_s0 + $0x1b8] sm:$0xff]  }
  0xc0   : > { %1706 = vmatprep.mubr.bf16.mxu0 %v6422_v2  ;;  %2026 = vmatprep.mubr.bf16.mxu1 %v6422_v2 }
  0xc1   : > { %v5559_v33 = vpop.permute.xlu1 %3173  ;;  %v5561_v34 = vpop.permute.xlu0 %3168 }
  0xc2   : > { %3483 = vperm.xlu1 %4811, %v3005_v31   ;;  %3478 = vperm.xlu0 %4810, %v3004_v32   ;;  %v3021_v32 = vld [vmem:[%s6420_s2 + $0x338] sm:$0xff] }
  0xc5   : > { %v5575_v41 = vpop.permute.xlu1 %3183  ;;  %v5577_v44 = vpop.permute.xlu0 %3178 }
  0xc6   : > { %3493 = vperm.xlu1 %4811, %v3007_v35   ;;  %3488 = vperm.xlu0 %4810, %v3006_v38   ;;  %v3020_v35 = vld [vmem:[%s6420_s2 + $0x330] sm:$0xff] }
  0xc7   : > { %4697 = vmatmul.mubr.msk.bf16.gmra.mxu0 %vm1274_vm1, %v4857_v39  ;;  %4729 = vmatmul.mubr.msk.bf16.gmra.mxu1 %vm1274_vm1, %v4858_v40  ;;  %v3023_v40 = vld [vmem:[%s6420_s2 + $0x348] sm:$0xff] }
  0xc8   : > { %1716 = vmatprep.mubr.bf16.mxu0 %v6422_v2  ;;  %2036 = vmatprep.mubr.bf16.mxu1 %v6422_v2 }
  0xc9   : > { %v5589_v49 = vpop.permute.xlu1 %3193  ;;  %v5591_v50 = vpop.permute.xlu0 %3188 }
  0xca   : > { %3503 = vperm.xlu1 %4811, %v3009_v45   ;;  %3498 = vperm.xlu0 %4810, %v3008_v48   ;;  %v3022_v45 = vld [vmem:[%s6420_s2 + $0x340] sm:$0xff] }
  0xcb   : > { %v4865_v48 = vld [vmem:[%s6418_s0 + $0xc0] sm:$0xff]  }
  0xcd   : > { %v5605_v59 = vpop.permute.xlu1 %3203  ;;  %v5607_v60 = vpop.permute.xlu0 %3198 }
  0xce   : > { %3513 = vperm.xlu1 %4811, %v3011_v51   ;;  %3508 = vperm.xlu0 %4810, %v3010_v54   ;;  %v4866_v51 = vld [vmem:[%s6418_s0 + $0x1c0] sm:$0xff]  }
  0xcf   : > { %4698 = vmatmul.mubr.msk.bf16.gmra.mxu0 %vm1274_vm1, %v4859_v55  ;;  %4730 = vmatmul.mubr.msk.bf16.gmra.mxu1 %vm1274_vm1, %v4860_v58 }
  0xd0   : > { %1726 = vmatprep.mubr.bf16.mxu0 %v6422_v2  ;;  %2046 = vmatprep.mubr.bf16.mxu1 %v6422_v2 }
  0xd1   : > { %v5619_v1 = vpop.permute.xlu1 %3213  ;;  %v5621_v5 = vpop.permute.xlu0 %3208 }
  0xd2   : > { %3523 = vperm.xlu1 %4811, %v3013_v61   ;;  %3518 = vperm.xlu0 %4810, %v3012_v0   ;;  %v3025_v0 = vld [vmem:[%s6420_s2 + $0x358] sm:$0xff] }
  0xd5   : > { %v5635_v12 = vpop.permute.xlu1 %3223  ;;  %v5637_v15 = vpop.permute.xlu0 %3218 }
  0xd6   : > { %3533 = vperm.xlu1 %4811, %v3015_v6   ;;  %3528 = vperm.xlu0 %4810, %v3014_v7   ;;  %v3024_v6 = vld [vmem:[%s6420_s2 + $0x350] sm:$0xff] }
  0xd7   : > { %4699 = vmatmul.mubr.msk.bf16.gmra.mxu0 %vm1274_vm1, %v4861_v8  ;;  %4731 = vmatmul.mubr.msk.bf16.gmra.mxu1 %vm1274_vm1, %v4862_v11 }
  0xd8   : > { %1736 = vmatprep.mubr.bf16.mxu0 %v6422_v2  ;;  %2056 = vmatprep.mubr.bf16.mxu1 %v6422_v2 }
  0xd9   : > { %v5649_v18 = vpop.permute.xlu1 %3233  ;;  %v5651_v21 = vpop.permute.xlu0 %3228 }
  0xda   : > { %6454 = vst [vmem:[#allocation6_spill] sm:$0xff] %v5649_v18  ;;  %6455 = vst [vmem:[#allocation7_spill] sm:$0xff] %v5651_v21  ;;  %3543 = vperm.xlu1 %4811, %v3017_v16   ;;  %3538 = vperm.xlu0 %4810, %v3016_v17  }
  0xdd   : > { %v5665_v28 = vpop.permute.xlu1 %3243  ;;  %v5667_v31 = vpop.permute.xlu0 %3238 }
  0xde   : > { %6456 = vst [vmem:[#allocation8_spill] sm:$0xff] %v5665_v28  ;;  %6457 = vst [vmem:[#allocation9_spill] sm:$0xff] %v5667_v31  ;;  %3553 = vperm.xlu1 %4811, %v3019_v22   ;;  %3548 = vperm.xlu0 %4810, %v3018_v25  }
  0xdf   : > { %4700 = vmatmul.mubr.msk.bf16.gmra.mxu0 %vm1274_vm1, %v4863_v26  ;;  %4732 = vmatmul.mubr.msk.bf16.gmra.mxu1 %vm1274_vm1, %v4864_v27  ;;  %v4867_v26 = vld [vmem:[%s6418_s0 + $0xc8] sm:$0xff]  }
  0xe0   : > { %1746 = vmatprep.mubr.bf16.mxu0 %v6422_v2  ;;  %2066 = vmatprep.mubr.bf16.mxu1 %v6422_v2 }
  0xe1   : > { %v5679_v38 = vpop.permute.xlu1 %3253  ;;  %v5681_v39 = vpop.permute.xlu0 %3248 }
  0xe2   : > { %6458 = vst [vmem:[#allocation10_spill] sm:$0xff] %v5679_v38  ;;  %6459 = vst [vmem:[#allocation11_spill] sm:$0xff] %v5681_v39  ;;  %3563 = vperm.xlu1 %4811, %v3021_v32   ;;  %3558 = vperm.xlu0 %4810, %v3020_v35   ;;  %v3027_v35 = vld [vmem:[%s6420_s2 + $0x368] sm:$0xff] }
  0xe5   : > { %v5696_v54 = vpop.permute.xlu1 %3263  ;;  %v5698_v55 = vpop.permute.xlu0 %3258 }
  0xe6   : > { %6460 = vst [vmem:[#allocation12_spill] sm:$0xff] %v5696_v54  ;;  %6461 = vst [vmem:[#allocation13_spill] sm:$0xff] %v5698_v55  ;;  %3573 = vperm.xlu1 %4811, %v3023_v40   ;;  %3568 = vperm.xlu0 %4810, %v3022_v45   ;;  %v4868_v40 = vld [vmem:[%s6418_s0 + $0x1c8] sm:$0xff]  }
  0xe7   : > { %v1508_v58 = vpop.f32.mrf.mxu0  ;;  %4701 = vmatmul.mubr.msk.bf16.gmra.mxu0 %vm1274_vm1, %v4865_v48  ;;  %v5703_v61 = vpop.f32.mrf.mxu1  ;;  %4733 = vmatmul.mubr.msk.bf16.gmra.mxu1 %vm1274_vm1, %v4866_v51 }
  0xe8   : > { %v3686_v7 = vadd.f32 %v5381_v37, %v1508_v58  ;;  %1756 = vmatprep.mubr.bf16.mxu0 %v6422_v2  ;;  %2076 = vmatprep.mubr.bf16.mxu1 %v6422_v2 }
  0xe9   : > { %v1510_v8 = vpop.f32.mrf.mxu0  ;;  %v5715_v11 = vpop.f32.mrf.mxu1 }
  0xea   : > { %v3942_v16 = vmax.f32 %v3686_v7, 0.0  ;;  %v3687_v17 = vadd.f32 %v5381_v37, %v1510_v8  ;;  %v5718_v22 = vpop.permute.xlu1 %3273  ;;  %v5720_v25 = vpop.permute.xlu0 %3268  ;;  %3583 = vperm.xlu1 %4811, %v3025_v0   ;;  %3578 = vperm.xlu0 %4810, %v3024_v6   ;;  %v3026_v37 = vld [vmem:[%s6420_s2 + $0x360] sm:$0xff] }
  0xeb   : > { %6462 = vst [vmem:[#allocation14_spill] sm:$0xff] %v5718_v22  ;;  %6463 = vst [vmem:[#allocation15_spill] sm:$0xff] %v5720_v25  ;;  %v1512_v27 = vpop.f32.mrf.mxu0  ;;  %v5725_v32 = vpop.f32.mrf.mxu1 }
  0xec   : > { %4198 = vst [vmem:[%s5736_s8] sm:$0xff] %v3942_v16  ;;  %v3943_v45 = vmax.f32 %v3687_v17, 0.0  ;;  %v3688_v48 = vadd.f32 %v5397_v43, %v1512_v27  ;;  %v3029_v17 = vld [vmem:[%s6420_s2 + $0x378] sm:$0xff] }
  0xed   : > { %v1514_v51 = vpop.f32.mrf.mxu0  ;;  %v5740_v58 = vpop.f32.mrf.mxu1 }
  0xee   : > { %4199 = vst [vmem:[%s5736_s8 + $0x8] sm:$0xff] %v3943_v45  ;;  %v3944_v0 = vmax.f32 %v3688_v48, 0.0  ;;  %v3689_v6 = vadd.f32 %v5397_v43, %v1514_v51  ;;  %v5744_v7 = vpop.permute.xlu1 %3283  ;;  %v5746_v8 = vpop.permute.xlu0 %3278  ;;  %3593 = vperm.xlu1 %4811, %v3027_v35   ;;  %3588 = vperm.xlu0 %4810, %v3026_v37   ;;  %v3028_v43 = vld [vmem:[%s6420_s2 + $0x370] sm:$0xff]  ;;  %v6466_v37 = vmov 0  }
  0xef   : > { %6464 = vst [vmem:[#allocation16_spill] sm:$0xff] %v5744_v7  ;;  %6465 = vst [vmem:[#allocation17_spill] sm:$0xff] %v5746_v8  ;;  %v1518_v2 = vpop.f32.mrf.mxu0  ;;  %4702 = vmatmul.mubr.msk.bf16.gmra.mxu0 %vm1274_vm1, %v4867_v26  ;;  %v5749_v16 = vpop.f32.mrf.mxu1  ;;  %4734 = vmatmul.mubr.msk.bf16.gmra.mxu1 %vm1274_vm1, %v4868_v40 }
  0xf0   : > { %4200 = vst [vmem:[%s5736_s8 + $0x10] sm:$0xff] %v3944_v0  ;;  %v3945_v27 = vmax.f32 %v3689_v6, 0.0  ;;  %v3690_v35 = vadd.f32 %v5379_v36, %v1518_v2  ;;  %1766 = vmatprep.mubr.bf16.mxu0 %v6466_v37  ;;  %2086 = vmatprep.mubr.bf16.mxu1 %v6466_v37  ;;  %v4869_v2 = vld [vmem:[%s6418_s0 + $0xd0] sm:$0xff]  }
  0xf1   : > { %v1520_v26 = vpop.f32.mrf.mxu0  ;;  %v5762_v45 = vpop.f32.mrf.mxu1 }
  0xf2   : > { %4201 = vst [vmem:[%s5736_s8 + $0x18] sm:$0xff] %v3945_v27  ;;  %v3946_v40 = vmax.f32 %v3690_v35, 0.0  ;;  %v3691_v48 = vadd.f32 %v5379_v36, %v1520_v26  ;;  %v5766_v51 = vpop.permute.xlu1 %3293  ;;  %v5768_v7 = vpop.permute.xlu0 %3288  ;;  %3603 = vperm.xlu1 %4811, %v3029_v17   ;;  %3598 = vperm.xlu0 %4810, %v3028_v43   ;;  %v3031_v27 = vld [vmem:[%s6420_s2 + $0x388] sm:$0xff]  ;;  %v3030_v36 = vld [vmem:[%s6420_s2 + $0x380] sm:$0xff]  ;;  %v4870_v17 = vld [vmem:[%s6418_s0 + $0x1d0] sm:$0xff]  }
  0xf3   : > { %6467 = vst [vmem:[#allocation18_spill] sm:$0xff] %v5766_v51  ;;  %6468 = vst [vmem:[#allocation19_spill] sm:$0xff] %v5768_v7  ;;  %v1522_v0 = vpop.f32.mrf.mxu0  ;;  %v5773_v6 = vpop.f32.mrf.mxu1 }
  0xf4   : > { %4202 = vst [vmem:[%s5736_s8 + $0x20] sm:$0xff] %v3946_v40  ;;  %v3947_v43 = vmax.f32 %v3691_v48, 0.0  ;;  %v3692_v35 = vadd.f32 %v5395_v42, %v1522_v0  ;;  %v3033_v48 = vld [vmem:[%s6420_s2 + $0x398] sm:$0xff] }
  0xf5   : > { %v1524_v26 = vpop.f32.mrf.mxu0  ;;  %v5786_v51 = vpop.f32.mrf.mxu1 }
  0xf6   : > { %4203 = vst [vmem:[%s5736_s8 + $0x28] sm:$0xff] %v3947_v43  ;;  %v3948_v7 = vmax.f32 %v3692_v35, 0.0  ;;  %v3693_v8 = vadd.f32 %v5395_v42, %v1524_v26  ;;  %v5790_v22 = vpop.permute.xlu1 %3303  ;;  %v5792_v25 = vpop.permute.xlu0 %3298  ;;  %3613 = vperm.xlu1 %4811, %v3031_v27   ;;  %3608 = vperm.xlu0 %4810, %v3030_v36   ;;  %v3032_v42 = vld [vmem:[%s6420_s2 + $0x390] sm:$0xff] }
  0xf7   : > { %6469 = vst [vmem:[#allocation20_spill] sm:$0xff] %v5790_v22  ;;  %6470 = vst [vmem:[#allocation21_spill] sm:$0xff] %v5792_v25  ;;  %v1528_v54 = vpop.f32.mrf.mxu0  ;;  %4703 = vmatmul.mubr.msk.bf16.gmra.mxu0 %vm1274_vm1, %v4869_v2  ;;  %v5795_v40 = vpop.f32.mrf.mxu1  ;;  %4735 = vmatmul.mubr.msk.bf16.gmra.mxu1 %vm1274_vm1, %v4870_v17 }
  0xf8   : > { %4204 = vst [vmem:[%s5736_s8 + $0x30] sm:$0xff] %v3948_v7  ;;  %v3949_v0 = vmax.f32 %v3693_v8, 0.0  ;;  %v3694_v27 = vadd.f32 %v5411_v47, %v1528_v54  ;;  %1776 = vmatprep.mubr.bf16.mxu0 %v6466_v37  ;;  %2096 = vmatprep.mubr.bf16.mxu1 %v6466_v37  ;;  %v4871_v54 = vld [vmem:[%s6418_s0 + $0xd8] sm:$0xff]  }
  0xf9   : > { %v1530_v2 = vpop.f32.mrf.mxu0  ;;  %v5808_v36 = vpop.f32.mrf.mxu1 }
  0xfa   : > { %4205 = vst [vmem:[%s5736_s8 + $0x38] sm:$0xff] %v3949_v0  ;;  %v3950_v17 = vmax.f32 %v3694_v27, 0.0  ;;  %v3695_v43 = vadd.f32 %v5411_v47, %v1530_v2  ;;  %v5812_v35 = vpop.permute.xlu1 %3313  ;;  %v5814_v26 = vpop.permute.xlu0 %3308  ;;  %3623 = vperm.xlu1 %4811, %v3033_v48   ;;  %3618 = vperm.xlu0 %4810, %v3032_v42   ;;  %v3035_v0 = vld [vmem:[%s6420_s2 + $0x3a8] sm:$0xff]  ;;  %v3034_v47 = vld [vmem:[%s6420_s2 + $0x3a0] sm:$0xff]  ;;  %v4872_v48 = vld [vmem:[%s6418_s0 + $0x1d8] sm:$0xff]  }
  0xfb   : > { %6471 = vst [vmem:[#allocation22_spill] sm:$0xff] %v5812_v35  ;;  %6472 = vst [vmem:[#allocation23_spill] sm:$0xff] %v5814_v26  ;;  %v1532_v7 = vpop.f32.mrf.mxu0  ;;  %v5819_v8 = vpop.f32.mrf.mxu1 }
  0xfc   : > { %4206 = vst [vmem:[%s5736_s8 + $0x40] sm:$0xff] %v3950_v17  ;;  %v3951_v42 = vmax.f32 %v3695_v43, 0.0  ;;  %v3696_v27 = vadd.f32 %v5409_v46, %v1532_v7  ;;  %v3037_v43 = vld [vmem:[%s6420_s2 + $0x3b8] sm:$0xff] }
  0xfd   : > { %v1534_v2 = vpop.f32.mrf.mxu0  ;;  %v5832_v35 = vpop.f32.mrf.mxu1 }
  0xfe   : > { %4207 = vst [vmem:[%s5736_s8 + $0x48] sm:$0xff] %v3951_v42  ;;  %v3952_v26 = vmax.f32 %v3696_v27, 0.0  ;;  %v3697_v22 = vadd.f32 %v5409_v46, %v1534_v2  ;;  %v5836_v25 = vpop.permute.xlu1 %3323  ;;  %v5838_v55 = vpop.permute.xlu0 %3318  ;;  %3633 = vperm.xlu1 %4811, %v3035_v0   ;;  %3628 = vperm.xlu0 %4810, %v3034_v47   ;;  %v3036_v46 = vld [vmem:[%s6420_s2 + $0x3b0] sm:$0xff] }
  0xff   : > { %6473 = vst [vmem:[#allocation24_spill] sm:$0xff] %v5836_v25  ;;  %6474 = vst [vmem:[#allocation25_spill] sm:$0xff] %v5838_v55  ;;  %v1538_v38 = vpop.f32.mrf.mxu0  ;;  %4704 = vmatmul.mubr.msk.bf16.gmra.mxu0 %vm1274_vm1, %v4871_v54  ;;  %v5841_v17 = vpop.f32.mrf.mxu1  ;;  %4736 = vmatmul.mubr.msk.bf16.gmra.mxu1 %vm1274_vm1, %v4872_v48 }
 0x100   : > { %4208 = vst [vmem:[%s5736_s8 + $0x50] sm:$0xff] %v3952_v26  ;;  %v3953_v7 = vmax.f32 %v3697_v22, 0.0  ;;  %v3698_v0 = vadd.f32 %v5427_v53, %v1538_v38  ;;  %1786 = vmatprep.mubr.bf16.mxu0 %v6466_v37  ;;  %2106 = vmatprep.mubr.bf16.mxu1 %v6466_v37  ;;  %v4873_v38 = vld [vmem:[%s6418_s0 + $0xe0] sm:$0xff]  }
 0x101   : > { %v1540_v54 = vpop.f32.mrf.mxu0  ;;  %v5854_v47 = vpop.f32.mrf.mxu1 }
 0x102   : > { %4209 = vst [vmem:[%s5736_s8 + $0x58] sm:$0xff] %v3953_v7  ;;  %v3954_v48 = vmax.f32 %v3698_v0, 0.0  ;;  %v3699_v42 = vadd.f32 %v5427_v53, %v1540_v54  ;;  %v5858_v27 = vpop.permute.xlu1 %3333  ;;  %v5860_v2 = vpop.permute.xlu0 %3328  ;;  %3643 = vperm.xlu1 %4811, %v3037_v43   ;;  %3638 = vperm.xlu0 %4810, %v3036_v46   ;;  %v3039_v7 = vld [vmem:[%s6420_s2 + $0x3c8] sm:$0xff]  ;;  %v3038_v53 = vld [vmem:[%s6420_s2 + $0x3c0] sm:$0xff] }
 0x103   : > { %6475 = vst [vmem:[#allocation26_spill] sm:$0xff] %v5858_v27  ;;  %6476 = vst [vmem:[#allocation27_spill] sm:$0xff] %v5860_v2  ;;  %v1542_v22 = vpop.f32.mrf.mxu0  ;;  %v5865_v26 = vpop.f32.mrf.mxu1  ;;  %v4874_v43 = vld [vmem:[%s6418_s0 + $0x1e0] sm:$0xff]  }
 0x104   : > { %4210 = vst [vmem:[%s5736_s8 + $0x60] sm:$0xff] %v3954_v48  ;;  %v3955_v46 = vmax.f32 %v3699_v42, 0.0  ;;  %v3700_v0 = vadd.f32 %v5425_v52, %v1542_v22  ;;  %v3041_v42 = vld [vmem:[%s6420_s2 + $0x3d8] sm:$0xff] }
 0x105   : > { %v1544_v54 = vpop.f32.mrf.mxu0  ;;  %v5878_v27 = vpop.f32.mrf.mxu1 }
 0x106   : > { %4211 = vst [vmem:[%s5736_s8 + $0x68] sm:$0xff] %v3955_v46  ;;  %v3956_v2 = vmax.f32 %v3700_v0, 0.0  ;;  %v3701_v25 = vadd.f32 %v5425_v52, %v1544_v54  ;;  %v5882_v55 = vpop.permute.xlu1 %3343  ;;  %v5884_v39 = vpop.permute.xlu0 %3338  ;;  %3653 = vperm.xlu1 %4811, %v3039_v7   ;;  %3648 = vperm.xlu0 %4810, %v3038_v53   ;;  %v3040_v52 = vld [vmem:[%s6420_s2 + $0x3d0] sm:$0xff] }
 0x107   : > { %6477 = vst [vmem:[#allocation28_spill] sm:$0xff] %v5882_v55  ;;  %6478 = vst [vmem:[#allocation29_spill] sm:$0xff] %v5884_v39  ;;  %v1548_v28 = vpop.f32.mrf.mxu0  ;;  %4705 = vmatmul.mubr.msk.bf16.gmra.mxu0 %vm1274_vm1, %v4873_v38  ;;  %v5887_v48 = vpop.f32.mrf.mxu1  ;;  %4737 = vmatmul.mubr.msk.bf16.gmra.mxu1 %vm1274_vm1, %v4874_v43 }
 0x108   : > { %4212 = vst [vmem:[%s5736_s8 + $0x70] sm:$0xff] %v3956_v2  ;;  %v3957_v22 = vmax.f32 %v3701_v25, 0.0  ;;  %v3702_v7 = vadd.f32 %v5441_v57, %v1548_v28  ;;  %1796 = vmatprep.mubr.bf16.mxu0 %v6466_v37  ;;  %2116 = vmatprep.mubr.bf16.mxu1 %v6466_v37  ;;  %v4875_v28 = vld [vmem:[%s6418_s0 + $0xe8] sm:$0xff]  }
 0x109   : > { %v1550_v38 = vpop.f32.mrf.mxu0  ;;  %v5900_v53 = vpop.f32.mrf.mxu1 }
 0x10a   : > { %4213 = vst [vmem:[%s5736_s8 + $0x78] sm:$0xff] %v3957_v22  ;;  %v3958_v43 = vmax.f32 %v3702_v7, 0.0  ;;  %v3703_v46 = vadd.f32 %v5441_v57, %v1550_v38  ;;  %v5904_v0 = vpop.permute.xlu1 %3353  ;;  %v5906_v54 = vpop.permute.xlu0 %3348  ;;  %3663 = vperm.xlu1 %4811, %v3041_v42   ;;  %3658 = vperm.xlu0 %4810, %v3040_v52   ;;  %v3043_v22 = vld [vmem:[%s6420_s2 + $0x3e8] sm:$0xff]  ;;  %v3042_v57 = vld [vmem:[%s6420_s2 + $0x3e0] sm:$0xff] }
 0x10b   : > { %6479 = vst [vmem:[#allocation30_spill] sm:$0xff] %v5904_v0  ;;  %6480 = vst [vmem:[#allocation31_spill] sm:$0xff] %v5906_v54  ;;  %v1552_v25 = vpop.f32.mrf.mxu0  ;;  %v5911_v2 = vpop.f32.mrf.mxu1  ;;  %v4876_v42 = vld [vmem:[%s6418_s0 + $0x1e8] sm:$0xff]  }
 0x10c   : > { %4214 = vst [vmem:[%s5736_s8 + $0x80] sm:$0xff] %v3958_v43  ;;  %v3959_v52 = vmax.f32 %v3703_v46, 0.0  ;;  %v3704_v7 = vadd.f32 %v5439_v56, %v1552_v25  ;;  %v3045_v46 = vld [vmem:[%s6420_s2 + $0x3f8] sm:$0xff] }
 0x10d   : > { %v1554_v38 = vpop.f32.mrf.mxu0  ;;  %v5924_v0 = vpop.f32.mrf.mxu1 }
 0x10e   : > { %4215 = vst [vmem:[%s5736_s8 + $0x88] sm:$0xff] %v3959_v52  ;;  %v3960_v54 = vmax.f32 %v3704_v7, 0.0  ;;  %v3705_v55 = vadd.f32 %v5439_v56, %v1554_v38  ;;  %v5928_v39 = vpop.permute.xlu1 %3363  ;;  %v5930_v31 = vpop.permute.xlu0 %3358  ;;  %3673 = vperm.xlu1 %4811, %v3043_v22   ;;  %3668 = vperm.xlu0 %4810, %v3042_v57   ;;  %v3044_v56 = vld [vmem:[%s6420_s2 + $0x3f0] sm:$0xff] }
 0x10f   : > { %6481 = vst [vmem:[#allocation32_spill] sm:$0xff] %v5928_v39  ;;  %6482 = vst [vmem:[#allocation33_spill] sm:$0xff] %v5930_v31  ;;  %v1558_v18 = vpop.f32.mrf.mxu0  ;;  %4706 = vmatmul.mubr.msk.bf16.gmra.mxu0 %vm1274_vm1, %v4875_v28  ;;  %v5933_v43 = vpop.f32.mrf.mxu1  ;;  %4738 = vmatmul.mubr.msk.bf16.gmra.mxu1 %vm1274_vm1, %v4876_v42 }
 0x110   : > { %4216 = vst [vmem:[%s5736_s8 + $0x90] sm:$0xff] %v3960_v54  ;;  %v3961_v25 = vmax.f32 %v3705_v55, 0.0  ;;  %v3706_v22 = vadd.f32 %v5457_v63, %v1558_v18  ;;  %1806 = vmatprep.mubr.bf16.mxu0 %v6466_v37  ;;  %2126 = vmatprep.mubr.bf16.mxu1 %v6466_v37 }
 0x111   : > { %v1560_v28 = vpop.f32.mrf.mxu0  ;;  %v5946_v57 = vpop.f32.mrf.mxu1 }
 0x112   : > { %4217 = vst [vmem:[%s5736_s8 + $0x98] sm:$0xff] %v3961_v25  ;;  %v3962_v42 = vmax.f32 %v3706_v22, 0.0  ;;  %v3707_v52 = vadd.f32 %v5457_v63, %v1560_v28  ;;  %v3374_v7 = vpop.permute.xlu1 %3373  ;;  %v3369_v38 = vpop.permute.xlu0 %3368  ;;  %3683 = vperm.xlu1 %4811, %v3045_v46   ;;  %3678 = vperm.xlu0 %4810, %v3044_v56   ;;  %v4877_v63 = vld [vmem:[%s6418_s0 + $0xf0] sm:$0xff]  }
 0x113   : > { %v3816_v55 = vadd.f32 %v3374_v7, %v5725_v32  ;;  %v3817_v18 = vadd.f32 %v3374_v7, %v5740_v58  ;;  %v3814_v54 = vadd.f32 %v3369_v38, %v5703_v61  ;;  %v3815_v39 = vadd.f32 %v3369_v38, %v5715_v11  ;;  %v1562_v31 = vpop.f32.mrf.mxu0  ;;  %v5954_v21 = vpop.f32.mrf.mxu1  ;;  %v4878_v61 = vld [vmem:[%s6418_s0 + $0x1f0] sm:$0xff]  }
 0x114   : > { %4218 = vst [vmem:[%s5736_s8 + $0xa0] sm:$0xff] %v3962_v42  ;;  %v3963_v46 = vmax.f32 %v3707_v52, 0.0  ;;  %v3708_v32 = vadd.f32 %v5455_v62, %v1562_v31 }
 0x115   : > { %v4072_v11 = vmax.f32 %v3816_v55, 0.0  ;;  %v4073_v58 = vmax.f32 %v3817_v18, 0.0  ;;  %v4070_v56 = vmax.f32 %v3814_v54, 0.0  ;;  %v4071_v25 = vmax.f32 %v3815_v39, 0.0  ;;  %v1564_v22 = vpop.f32.mrf.mxu0  ;;  %v5964_v28 = vpop.f32.mrf.mxu1 }
 0x116   : > { %4219 = vst [vmem:[%s5736_s8 + $0xa8] sm:$0xff] %v3963_v46  ;;  %v3964_v42 = vmax.f32 %v3708_v32, 0.0  ;;  %v3709_v52 = vadd.f32 %v5455_v62, %v1564_v22  ;;  %v3384_v7 = vpop.permute.xlu1 %3383  ;;  %v3379_v38 = vpop.permute.xlu0 %3378 }
 0x117   : > { %4328 = vst [vmem:[%s5736_s8 + $0x410] sm:$0xff] %v4072_v11  ;;  %4329 = vst [vmem:[%s5736_s8 + $0x418] sm:$0xff] %v4073_v58  ;;  %v3820_v31 = vadd.f32 %v3384_v7, %v5773_v6  ;;  %v3821_v55 = vadd.f32 %v3384_v7, %v5786_v51  ;;  %v3818_v39 = vadd.f32 %v3379_v38, %v5749_v16  ;;  %v1568_v54 = vpop.f32.mrf.mxu0  ;;  %4707 = vmatmul.mubr.msk.bf16.gmra.mxu0 %vm1274_vm1, %v4877_v63  ;;  %v5977_v46 = vpop.f32.mrf.mxu1 }
 0x118   : > { %4326 = vst [vmem:[%s5736_s8 + $0x400] sm:$0xff] %v4070_v56  ;;  %4327 = vst [vmem:[%s5736_s8 + $0x408] sm:$0xff] %v4071_v25  ;;  %v3819_v18 = vadd.f32 %v3379_v38, %v5762_v45  ;;  %v3965_v62 = vmax.f32 %v3709_v52, 0.0  ;;  %v3710_v32 = vadd.f32 %v5471_v4, %v1568_v54  ;;  %4739 = vmatmul.mubr.msk.bf16.gmra.mxu1 %vm1274_vm1, %v4878_v61  ;;  %1816 = vmatprep.mubr.bf16.mxu0 %v6466_v37 }
 0x119   : > { %4220 = vst [vmem:[%s5736_s8 + $0xb0] sm:$0xff] %v3964_v42  ;;  %v4076_v16 = vmax.f32 %v3820_v31, 0.0  ;;  %v4077_v45 = vmax.f32 %v3821_v55, 0.0  ;;  %v4074_v51 = vmax.f32 %v3818_v39, 0.0  ;;  %v1570_v11 = vpop.f32.mrf.mxu0  ;;  %v5983_v63 = vpop.f32.mrf.mxu1  ;;  %2136 = vmatprep.mubr.bf16.mxu1 %v6466_v37 }
 0x11a   : > { %v4075_v6 = vmax.f32 %v3819_v18, 0.0  ;;  %4221 = vst [vmem:[%s5736_s8 + $0xb8] sm:$0xff] %v3965_v62  ;;  %v3966_v58 = vmax.f32 %v3710_v32, 0.0  ;;  %v3711_v56 = vadd.f32 %v5471_v4, %v1570_v11  ;;  %v3394_v25 = vpop.permute.xlu1 %3393  ;;  %v3389_v61 = vpop.permute.xlu0 %3388  ;;  %v4879_v4 = vld [vmem:[%s6418_s0 + $0xf8] sm:$0xff]  }
 0x11b   : > { %4332 = vst [vmem:[%s5736_s8 + $0x430] sm:$0xff] %v4076_v16  ;;  %4333 = vst [vmem:[%s5736_s8 + $0x438] sm:$0xff] %v4077_v45  ;;  %v3824_v22 = vadd.f32 %v3394_v25, %v5819_v8  ;;  %v3825_v42 = vadd.f32 %v3394_v25, %v5832_v35  ;;  %v3822_v52 = vadd.f32 %v3389_v61, %v5795_v40  ;;  %v1572_v7 = vpop.f32.mrf.mxu0  ;;  %v5996_v38 = vpop.f32.mrf.mxu1  ;;  %v4880_v40 = vld [vmem:[%s6418_s0 + $0x1f8] sm:$0xff]  }
 0x11c   : > { %4330 = vst [vmem:[%s5736_s8 + $0x420] sm:$0xff] %v4074_v51  ;;  %4331 = vst [vmem:[%s5736_s8 + $0x428] sm:$0xff] %v4075_v6  ;;  %v3823_v37 = vadd.f32 %v3389_v61, %v5808_v36  ;;  %v3967_v31 = vmax.f32 %v3711_v56, 0.0  ;;  %v3712_v8 = vadd.f32 %v5469_v3, %v1572_v7 }
 0x11d   : > { %4222 = vst [vmem:[%s5736_s8 + $0xc0] sm:$0xff] %v3966_v58  ;;  %v4080_v36 = vmax.f32 %v3824_v22, 0.0  ;;  %v4081_v35 = vmax.f32 %v3825_v42, 0.0  ;;  %v4078_v55 = vmax.f32 %v3822_v52, 0.0  ;;  %v1574_v18 = vpop.f32.mrf.mxu0  ;;  %v6006_v54 = vpop.f32.mrf.mxu1 }
 0x11e   : > { %v4079_v39 = vmax.f32 %v3823_v37, 0.0  ;;  %4223 = vst [vmem:[%s5736_s8 + $0xc8] sm:$0xff] %v3967_v31  ;;  %v3968_v62 = vmax.f32 %v3712_v8, 0.0  ;;  %v3713_v32 = vadd.f32 %v5469_v3, %v1574_v18  ;;  %v3404_v16 = vpop.permute.xlu1 %3403  ;;  %v3399_v45 = vpop.permute.xlu0 %3398 }
 0x11f   : > { %4336 = vst [vmem:[%s5736_s8 + $0x450] sm:$0xff] %v4080_v36  ;;  %4337 = vst [vmem:[%s5736_s8 + $0x458] sm:$0xff] %v4081_v35  ;;  %v3828_v51 = vadd.f32 %v3404_v16, %v5865_v26  ;;  %v3829_v6 = vadd.f32 %v3404_v16, %v5878_v27  ;;  %v3826_v11 = vadd.f32 %v3399_v45, %v5841_v17  ;;  %v1578_v56 = vpop.f32.mrf.mxu0  ;;  %4708 = vmatmul.mubr.msk.bf16.gmra.mxu0 %vm1274_vm1, %v4879_v4  ;;  %v6019_v25 = vpop.f32.mrf.mxu1 }
 0x120   : > { %4334 = vst [vmem:[%s5736_s8 + $0x440] sm:$0xff] %v4078_v55  ;;  %4335 = vst [vmem:[%s5736_s8 + $0x448] sm:$0xff] %v4079_v39  ;;  %v3827_v58 = vadd.f32 %v3399_v45, %v5854_v47  ;;  %v3969_v3 = vmax.f32 %v3713_v32, 0.0  ;;  %v3714_v61 = vadd.f32 %v5487_v10, %v1578_v56  ;;  %4740 = vmatmul.mubr.msk.bf16.gmra.mxu1 %vm1274_vm1, %v4880_v40 }
 0x121   : > { %4224 = vst [vmem:[%s5736_s8 + $0xd0] sm:$0xff] %v3968_v62  ;;  %v4084_v27 = vmax.f32 %v3828_v51, 0.0  ;;  %v4085_v26 = vmax.f32 %v3829_v6, 0.0  ;;  %v4082_v17 = vmax.f32 %v3826_v11, 0.0  ;;  %v1580_v47 = vpop.f32.mrf.mxu0  ;;  %v6024_v42 = vpop.f32.mrf.mxu1 }
 0x122   : > { %v4083_v22 = vmax.f32 %v3827_v58, 0.0  ;;  %4225 = vst [vmem:[%s5736_s8 + $0xd8] sm:$0xff] %v3969_v3  ;;  %v3970_v52 = vmax.f32 %v3714_v61, 0.0  ;;  %v3715_v37 = vadd.f32 %v5487_v10, %v1580_v47  ;;  %v3414_v7 = vpop.permute.xlu1 %3413  ;;  %v3409_v4 = vpop.permute.xlu0 %3408 }
 0x123   : > { %4340 = vst [vmem:[%s5736_s8 + $0x470] sm:$0xff] %v4084_v27  ;;  %4341 = vst [vmem:[%s5736_s8 + $0x478] sm:$0xff] %v4085_v26  ;;  %v3832_v31 = vadd.f32 %v3414_v7, %v5911_v2  ;;  %v3833_v8 = vadd.f32 %v3414_v7, %v5924_v0  ;;  %v3830_v40 = vadd.f32 %v3409_v4, %v5887_v48  ;;  %v1582_v35 = vpop.f32.mrf.mxu0  ;;  %v6036_v55 = vpop.f32.mrf.mxu1 }
 0x124   : > { %4338 = vst [vmem:[%s5736_s8 + $0x460] sm:$0xff] %v4082_v17  ;;  %4339 = vst [vmem:[%s5736_s8 + $0x468] sm:$0xff] %v4083_v22  ;;  %v3831_v36 = vadd.f32 %v3409_v4, %v5900_v53  ;;  %v3971_v10 = vmax.f32 %v3715_v37, 0.0  ;;  %v3716_v39 = vadd.f32 %v5485_v9, %v1582_v35 }
 0x125   : > { %4226 = vst [vmem:[%s5736_s8 + $0xe0] sm:$0xff] %v3970_v52  ;;  %v4088_v18 = vmax.f32 %v3832_v31, 0.0  ;;  %v4089_v62 = vmax.f32 %v3833_v8, 0.0  ;;  %v4086_v2 = vmax.f32 %v3830_v40, 0.0  ;;  %v1584_v0 = vpop.f32.mrf.mxu0  ;;  %v1904_v16 = vpop.f32.mrf.mxu1 }
 0x126   : > { %v4087_v32 = vmax.f32 %v3831_v36, 0.0  ;;  %4227 = vst [vmem:[%s5736_s8 + $0xe8] sm:$0xff] %v3971_v10  ;;  %v3972_v48 = vmax.f32 %v3716_v39, 0.0  ;;  %v3717_v53 = vadd.f32 %v5485_v9, %v1584_v0  ;;  %v3424_v45 = vpop.permute.xlu1 %3423  ;;  %v3419_v51 = vpop.permute.xlu0 %3418 }
 0x127   : > { %4344 = vst [vmem:[%s5736_s8 + $0x490] sm:$0xff] %v4088_v18  ;;  %4345 = vst [vmem:[%s5736_s8 + $0x498] sm:$0xff] %v4089_v62  ;;  %v3836_v6 = vadd.f32 %v3424_v45, %v5954_v21  ;;  %v3837_v11 = vadd.f32 %v3424_v45, %v5964_v28  ;;  %v3834_v58 = vadd.f32 %v3419_v51, %v5933_v43  ;;  %v1588_v3 = vpop.f32.mrf.mxu0  ;;  %v6050_v61 = vpop.f32.mrf.mxu1 }
 0x128   : > { %4342 = vst [vmem:[%s5736_s8 + $0x480] sm:$0xff] %v4086_v2  ;;  %4343 = vst [vmem:[%s5736_s8 + $0x488] sm:$0xff] %v4087_v32  ;;  %v3835_v56 = vadd.f32 %v3419_v51, %v5946_v57  ;;  %v3973_v9 = vmax.f32 %v3717_v53, 0.0  ;;  %v3718_v27 = vadd.f32 %v5501_v14, %v1588_v3 }
 0x129   : > { %4228 = vst [vmem:[%s5736_s8 + $0xf0] sm:$0xff] %v3972_v48  ;;  %v4092_v26 = vmax.f32 %v3836_v6, 0.0  ;;  %v4093_v17 = vmax.f32 %v3837_v11, 0.0  ;;  %v4090_v21 = vmax.f32 %v3834_v58, 0.0  ;;  %v1590_v28 = vpop.f32.mrf.mxu0  ;;  %v1910_v47 = vpop.f32.mrf.mxu1 }
 0x12a   : > { %v4091_v22 = vmax.f32 %v3835_v56, 0.0  ;;  %4229 = vst [vmem:[%s5736_s8 + $0xf8] sm:$0xff] %v3973_v9  ;;  %v3974_v43 = vmax.f32 %v3718_v27, 0.0  ;;  %v3719_v57 = vadd.f32 %v5501_v14, %v1590_v28  ;;  %v3434_v52 = vpop.permute.xlu1 %3433  ;;  %v3429_v37 = vpop.permute.xlu0 %3428 }
 0x12b   : > { %4348 = vst [vmem:[%s5736_s8 + $0x4b0] sm:$0xff] %v4092_v26  ;;  %4349 = vst [vmem:[%s5736_s8 + $0x4b8] sm:$0xff] %v4093_v17  ;;  %v3840_v7 = vadd.f32 %v3434_v52, %v5996_v38  ;;  %v3841_v4 = vadd.f32 %v3434_v52, %v6006_v54  ;;  %v3838_v31 = vadd.f32 %v3429_v37, %v5977_v46  ;;  %v1592_v40 = vpop.f32.mrf.mxu0  ;;  %v1912_v36 = vpop.f32.mrf.mxu1 }
 0x12c   : > { %4346 = vst [vmem:[%s5736_s8 + $0x4a0] sm:$0xff] %v4090_v21  ;;  %4347 = vst [vmem:[%s5736_s8 + $0x4a8] sm:$0xff] %v4091_v22  ;;  %v3839_v8 = vadd.f32 %v3429_v37, %v5983_v63  ;;  %v3975_v14 = vmax.f32 %v3719_v57, 0.0  ;;  %v3720_v35 = vadd.f32 %v5499_v13, %v1592_v40 }
 0x12d   : > { %4230 = vst [vmem:[%s5736_s8 + $0x100] sm:$0xff] %v3974_v43  ;;  %v4096_v10 = vmax.f32 %v3840_v7, 0.0  ;;  %v4097_v39 = vmax.f32 %v3841_v4, 0.0  ;;  %v4094_v18 = vmax.f32 %v3838_v31, 0.0  ;;  %v1594_v62 = vpop.f32.mrf.mxu0  ;;  %v1914_v54 = vpop.f32.mrf.mxu1 }
 0x12e   : > { %v4095_v38 = vmax.f32 %v3839_v8, 0.0  ;;  %4231 = vst [vmem:[%s5736_s8 + $0x108] sm:$0xff] %v3975_v14  ;;  %v3976_v46 = vmax.f32 %v3720_v35, 0.0  ;;  %v3721_v63 = vadd.f32 %v5499_v13, %v1594_v62  ;;  %v3444_v2 = vpop.permute.xlu1 %3443  ;;  %v3439_v32 = vpop.permute.xlu0 %3438 }
 0x12f   : > { %4352 = vst [vmem:[%s5736_s8 + $0x4d0] sm:$0xff] %v4096_v10  ;;  %4353 = vst [vmem:[%s5736_s8 + $0x4d8] sm:$0xff] %v4097_v39  ;;  %v3844_v0 = vadd.f32 %v3444_v2, %v6036_v55  ;;  %v3845_v48 = vadd.f32 %v3444_v2, %v1904_v16  ;;  %v3842_v53 = vadd.f32 %v3439_v32, %v6019_v25  ;;  %v1598_v51 = vpop.f32.mrf.mxu0  ;;  %v1918_v6 = vpop.f32.mrf.mxu1 }
 0x130   : > { %4350 = vst [vmem:[%s5736_s8 + $0x4c0] sm:$0xff] %v4094_v18  ;;  %4351 = vst [vmem:[%s5736_s8 + $0x4c8] sm:$0xff] %v4095_v38  ;;  %v3843_v45 = vadd.f32 %v3439_v32, %v6024_v42  ;;  %v3977_v13 = vmax.f32 %v3721_v63, 0.0  ;;  %v3722_v11 = vadd.f32 %v5517_v20, %v1598_v51 }
 0x131   : > { %4232 = vst [vmem:[%s5736_s8 + $0x110] sm:$0xff] %v3976_v46  ;;  %v4100_v58 = vmax.f32 %v3844_v0, 0.0  ;;  %v4101_v56 = vmax.f32 %v3845_v48, 0.0  ;;  %v4098_v3 = vmax.f32 %v3842_v53, 0.0  ;;  %v1600_v55 = vpop.f32.mrf.mxu0  ;;  %v1920_v16 = vpop.f32.mrf.mxu1 }
 0x132   : > { %v4099_v9 = vmax.f32 %v3843_v45, 0.0  ;;  %4233 = vst [vmem:[%s5736_s8 + $0x118] sm:$0xff] %v3977_v13  ;;  %v3978_v25 = vmax.f32 %v3722_v11, 0.0  ;;  %v3723_v42 = vadd.f32 %v5517_v20, %v1600_v55  ;;  %v3454_v27 = vpop.permute.xlu1 %3453  ;;  %v3449_v26 = vpop.permute.xlu0 %3448 }
 0x133   : > { %4356 = vst [vmem:[%s5736_s8 + $0x4f0] sm:$0xff] %v4100_v58  ;;  %4357 = vst [vmem:[%s5736_s8 + $0x4f8] sm:$0xff] %v4101_v56  ;;  %v3848_v17 = vadd.f32 %v3454_v27, %v1912_v36  ;;  %v3849_v21 = vadd.f32 %v3454_v27, %v1914_v54  ;;  %v3846_v22 = vadd.f32 %v3449_v26, %v6050_v61  ;;  %v1602_v43 = vpop.f32.mrf.mxu0  ;;  %v1922_v57 = vpop.f32.mrf.mxu1 }
 0x134   : > { %4354 = vst [vmem:[%s5736_s8 + $0x4e0] sm:$0xff] %v4098_v3  ;;  %4355 = vst [vmem:[%s5736_s8 + $0x4e8] sm:$0xff] %v4099_v9  ;;  %v3847_v28 = vadd.f32 %v3449_v26, %v1910_v47  ;;  %v3979_v52 = vmax.f32 %v3723_v42, 0.0  ;;  %v3724_v20 = vadd.f32 %v5515_v19, %v1602_v43 }
 0x135   : > { %4234 = vst [vmem:[%s5736_s8 + $0x120] sm:$0xff] %v3978_v25  ;;  %v4104_v37 = vmax.f32 %v3848_v17, 0.0  ;;  %v4105_v7 = vmax.f32 %v3849_v21, 0.0  ;;  %v4102_v4 = vmax.f32 %v3846_v22, 0.0  ;;  %v1604_v8 = vpop.f32.mrf.mxu0  ;;  %v1924_v40 = vpop.f32.mrf.mxu1 }
 0x136   : > { %v4103_v31 = vmax.f32 %v3847_v28, 0.0  ;;  %4235 = vst [vmem:[%s5736_s8 + $0x128] sm:$0xff] %v3979_v52  ;;  %v3980_v61 = vmax.f32 %v3724_v20, 0.0  ;;  %v3725_v47 = vadd.f32 %v5515_v19, %v1604_v8  ;;  %v3464_v36 = vpop.permute.xlu1 %3463  ;;  %v3459_v14 = vpop.permute.xlu0 %3458 }
 0x137   : > { %4360 = vst [vmem:[%s5736_s8 + $0x510] sm:$0xff] %v4104_v37  ;;  %4361 = vst [vmem:[%s5736_s8 + $0x518] sm:$0xff] %v4105_v7  ;;  %v3852_v35 = vadd.f32 %v3464_v36, %v1922_v57  ;;  %v3853_v10 = vadd.f32 %v3464_v36, %v1924_v40  ;;  %v3850_v39 = vadd.f32 %v3459_v14, %v1918_v6  ;;  %v1608_v38 = vpop.f32.mrf.mxu0  ;;  %v1928_v62 = vpop.f32.mrf.mxu1 }
 0x138   : > { %4358 = vst [vmem:[%s5736_s8 + $0x500] sm:$0xff] %v4102_v4  ;;  %4359 = vst [vmem:[%s5736_s8 + $0x508] sm:$0xff] %v4103_v31  ;;  %v3851_v18 = vadd.f32 %v3459_v14, %v1920_v16  ;;  %v3981_v54 = vmax.f32 %v3725_v47, 0.0  ;;  %v3726_v19 = vadd.f32 %v5531_v24, %v1608_v38 }
 0x139   : > { %4236 = vst [vmem:[%s5736_s8 + $0x130] sm:$0xff] %v3980_v61  ;;  %v4108_v46 = vmax.f32 %v3852_v35, 0.0  ;;  %v4109_v63 = vmax.f32 %v3853_v10, 0.0  ;;  %v4106_v2 = vmax.f32 %v3850_v39, 0.0  ;;  %v1610_v0 = vpop.f32.mrf.mxu0  ;;  %v1930_v48 = vpop.f32.mrf.mxu1 }
 0x13a   : > { %v4107_v32 = vmax.f32 %v3851_v18, 0.0  ;;  %4237 = vst [vmem:[%s5736_s8 + $0x138] sm:$0xff] %v3981_v54  ;;  %v3982_v53 = vmax.f32 %v3726_v19, 0.0  ;;  %v3727_v45 = vadd.f32 %v5531_v24, %v1610_v0  ;;  %v3474_v51 = vpop.permute.xlu1 %3473  ;;  %v3469_v6 = vpop.permute.xlu0 %3468 }
 0x13b   : > { %4364 = vst [vmem:[%s5736_s8 + $0x530] sm:$0xff] %v4108_v46  ;;  %4365 = vst [vmem:[%s5736_s8 + $0x538] sm:$0xff] %v4109_v63  ;;  %v3854_v13 = vadd.f32 %v3469_v6, %v1928_v62  ;;  %v3855_v11 = vadd.f32 %v3469_v6, %v1930_v48  ;;  %v1612_v58 = vpop.f32.mrf.mxu0  ;;  %v1932_v56 = vpop.f32.mrf.mxu1 }
 0x13c   : > { %4362 = vst [vmem:[%s5736_s8 + $0x520] sm:$0xff] %v4106_v2  ;;  %4363 = vst [vmem:[%s5736_s8 + $0x528] sm:$0xff] %v4107_v32  ;;  %v3983_v3 = vmax.f32 %v3727_v45, 0.0  ;;  %v3728_v9 = vadd.f32 %v5529_v23, %v1612_v58  ;;  %v3856_v55 = vadd.f32 %v3474_v51, %v1932_v56 }
 0x13d   : > { %4238 = vst [vmem:[%s5736_s8 + $0x140] sm:$0xff] %v3982_v53  ;;  %v4110_v24 = vmax.f32 %v3854_v13, 0.0  ;;  %v4111_v16 = vmax.f32 %v3855_v11, 0.0  ;;  %v1614_v25 = vpop.f32.mrf.mxu0  ;;  %v1934_v42 = vpop.f32.mrf.mxu1 }
 0x13e   : > { %4239 = vst [vmem:[%s5736_s8 + $0x148] sm:$0xff] %v3983_v3  ;;  %v3984_v27 = vmax.f32 %v3728_v9, 0.0  ;;  %v4112_v26 = vmax.f32 %v3856_v55, 0.0  ;;  %v3729_v17 = vadd.f32 %v5529_v23, %v1614_v25  ;;  %v3857_v21 = vadd.f32 %v3474_v51, %v1934_v42  ;;  %v3479_v22 = vpop.permute.xlu0 %3478  ;;  %v3484_v23 = vpop.permute.xlu1 %3483 }
 0x13f   : > { %4366 = vst [vmem:[%s5736_s8 + $0x540] sm:$0xff] %v4110_v24  ;;  %4367 = vst [vmem:[%s5736_s8 + $0x548] sm:$0xff] %v4111_v16  ;;  %v1618_v28 = vpop.f32.mrf.mxu0  ;;  %v1938_v43 = vpop.f32.mrf.mxu1 }
 0x140   : > { %4240 = vst [vmem:[%s5736_s8 + $0x150] sm:$0xff] %v3984_v27  ;;  %4368 = vst [vmem:[%s5736_s8 + $0x550] sm:$0xff] %v4112_v26  ;;  %v3985_v57 = vmax.f32 %v3729_v17, 0.0  ;;  %v4113_v52 = vmax.f32 %v3857_v21, 0.0  ;;  %v3730_v20 = vadd.f32 %v5547_v30, %v1618_v28  ;;  %v3858_v37 = vadd.f32 %v3479_v22, %v1938_v43 }
 0x141   : > { %v1620_v7 = vpop.f32.mrf.mxu0  ;;  %v1940_v4 = vpop.f32.mrf.mxu1 }
 0x142   : > { %4241 = vst [vmem:[%s5736_s8 + $0x158] sm:$0xff] %v3985_v57  ;;  %4369 = vst [vmem:[%s5736_s8 + $0x558] sm:$0xff] %v4113_v52  ;;  %v3986_v31 = vmax.f32 %v3730_v20, 0.0  ;;  %v4114_v8 = vmax.f32 %v3858_v37, 0.0  ;;  %v3731_v40 = vadd.f32 %v5547_v30, %v1620_v7  ;;  %v3859_v61 = vadd.f32 %v3479_v22, %v1940_v4  ;;  %v3489_v62 = vpop.permute.xlu0 %3488  ;;  %v3494_v6 = vpop.permute.xlu1 %3493 }
 0x143   : > { %v1622_v47 = vpop.f32.mrf.mxu0  ;;  %v1942_v36 = vpop.f32.mrf.mxu1 }
 0x144   : > { %4242 = vst [vmem:[%s5736_s8 + $0x160] sm:$0xff] %v3986_v31  ;;  %4370 = vst [vmem:[%s5736_s8 + $0x560] sm:$0xff] %v4114_v8  ;;  %v3987_v14 = vmax.f32 %v3731_v40, 0.0  ;;  %v4115_v35 = vmax.f32 %v3859_v61, 0.0  ;;  %v3732_v10 = vadd.f32 %v5545_v29, %v1622_v47  ;;  %v3860_v39 = vadd.f32 %v3484_v23, %v1942_v36 }
 0x145   : > { %v1624_v18 = vpop.f32.mrf.mxu0  ;;  %v1944_v38 = vpop.f32.mrf.mxu1 }
 0x146   : > { %4243 = vst [vmem:[%s5736_s8 + $0x168] sm:$0xff] %v3987_v14  ;;  %4371 = vst [vmem:[%s5736_s8 + $0x568] sm:$0xff] %v4115_v35  ;;  %v3988_v54 = vmax.f32 %v3732_v10, 0.0  ;;  %v4116_v30 = vmax.f32 %v3860_v39, 0.0  ;;  %v3733_v19 = vadd.f32 %v5545_v29, %v1624_v18  ;;  %v3861_v46 = vadd.f32 %v3484_v23, %v1944_v38  ;;  %v3499_v27 = vpop.permute.xlu0 %3498  ;;  %v3504_v4 = vpop.permute.xlu1 %3503 }
 0x147   : > { %v1628_v63 = vpop.f32.mrf.mxu0  ;;  %v1948_v2 = vpop.f32.mrf.mxu1 }
 0x148   : > { %4244 = vst [vmem:[%s5736_s8 + $0x170] sm:$0xff] %v3988_v54  ;;  %4372 = vst [vmem:[%s5736_s8 + $0x570] sm:$0xff] %v4116_v30  ;;  %v3989_v32 = vmax.f32 %v3733_v19, 0.0  ;;  %v4117_v0 = vmax.f32 %v3861_v46, 0.0  ;;  %v3734_v48 = vadd.f32 %v5561_v34, %v1628_v63  ;;  %v3862_v53 = vadd.f32 %v3489_v62, %v1948_v2 }
 0x149   : > { %v1630_v45 = vpop.f32.mrf.mxu0  ;;  %v1950_v51 = vpop.f32.mrf.mxu1 }
 0x14a   : > { %4245 = vst [vmem:[%s5736_s8 + $0x178] sm:$0xff] %v3989_v32  ;;  %4373 = vst [vmem:[%s5736_s8 + $0x578] sm:$0xff] %v4117_v0  ;;  %v3990_v13 = vmax.f32 %v3734_v48, 0.0  ;;  %v4118_v29 = vmax.f32 %v3862_v53, 0.0  ;;  %v3735_v11 = vadd.f32 %v5561_v34, %v1630_v45  ;;  %v3863_v58 = vadd.f32 %v3489_v62, %v1950_v51  ;;  %v3509_v18 = vpop.permute.xlu0 %3508  ;;  %v3514_v53 = vpop.permute.xlu1 %3513 }
 0x14b   : > { %v1632_v56 = vpop.f32.mrf.mxu0  ;;  %v1952_v3 = vpop.f32.mrf.mxu1 }
 0x14c   : > { %4246 = vst [vmem:[%s5736_s8 + $0x180] sm:$0xff] %v3990_v13  ;;  %4374 = vst [vmem:[%s5736_s8 + $0x580] sm:$0xff] %v4118_v29  ;;  %v3991_v9 = vmax.f32 %v3735_v11, 0.0  ;;  %v4119_v55 = vmax.f32 %v3863_v58, 0.0  ;;  %v3736_v24 = vadd.f32 %v5559_v33, %v1632_v56  ;;  %v3864_v16 = vadd.f32 %v3494_v6, %v1952_v3 }
 0x14d   : > { %v1634_v25 = vpop.f32.mrf.mxu0  ;;  %v1954_v42 = vpop.f32.mrf.mxu1 }
 0x14e   : > { %4247 = vst [vmem:[%s5736_s8 + $0x188] sm:$0xff] %v3991_v9  ;;  %4375 = vst [vmem:[%s5736_s8 + $0x588] sm:$0xff] %v4119_v55  ;;  %v3992_v26 = vmax.f32 %v3736_v24, 0.0  ;;  %v4120_v34 = vmax.f32 %v3864_v16, 0.0  ;;  %v3737_v17 = vadd.f32 %v5559_v33, %v1634_v25  ;;  %v3865_v21 = vadd.f32 %v3494_v6, %v1954_v42  ;;  %v3519_v24 = vpop.permute.xlu0 %3518 }
 0x14f   : > { %v1638_v22 = vpop.f32.mrf.mxu0  ;;  %v1958_v28 = vpop.f32.mrf.mxu1 }
 0x150   : > { %4248 = vst [vmem:[%s5736_s8 + $0x190] sm:$0xff] %v3992_v26  ;;  %4376 = vst [vmem:[%s5736_s8 + $0x590] sm:$0xff] %v4120_v34  ;;  %v3993_v43 = vmax.f32 %v3737_v17, 0.0  ;;  %v4121_v57 = vmax.f32 %v3865_v21, 0.0  ;;  %v3738_v52 = vadd.f32 %v5577_v44, %v1638_v22  ;;  %v3866_v20 = vadd.f32 %v3499_v27, %v1958_v28 }
 0x151   : > { %v1640_v37 = vpop.f32.mrf.mxu0  ;;  %v1960_v7 = vpop.f32.mrf.mxu1 }
 0x152   : > { %4249 = vst [vmem:[%s5736_s8 + $0x198] sm:$0xff] %v3993_v43  ;;  %4377 = vst [vmem:[%s5736_s8 + $0x598] sm:$0xff] %v4121_v57  ;;  %v3994_v23 = vmax.f32 %v3738_v52, 0.0  ;;  %v4122_v33 = vmax.f32 %v3866_v20, 0.0  ;;  %v3739_v31 = vadd.f32 %v5577_v44, %v1640_v37  ;;  %v3867_v8 = vadd.f32 %v3499_v27, %v1960_v7  ;;  %v3524_v57 = vpop.permute.xlu1 %3523 }
 0x153   : > { %v1642_v40 = vpop.f32.mrf.mxu0  ;;  %v1962_v61 = vpop.f32.mrf.mxu1 }
 0x154   : > { %4250 = vst [vmem:[%s5736_s8 + $0x1a0] sm:$0xff] %v3994_v23  ;;  %4378 = vst [vmem:[%s5736_s8 + $0x5a0] sm:$0xff] %v4122_v33  ;;  %v3995_v47 = vmax.f32 %v3739_v31, 0.0  ;;  %v4123_v36 = vmax.f32 %v3867_v8, 0.0  ;;  %v3740_v14 = vadd.f32 %v5575_v41, %v1642_v40  ;;  %v3868_v35 = vadd.f32 %v3504_v4, %v1962_v61 }
 0x155   : > { %v1644_v10 = vpop.f32.mrf.mxu0  ;;  %v1964_v39 = vpop.f32.mrf.mxu1 }
 0x156   : > { %4251 = vst [vmem:[%s5736_s8 + $0x1a8] sm:$0xff] %v3995_v47  ;;  %4379 = vst [vmem:[%s5736_s8 + $0x5a8] sm:$0xff] %v4123_v36  ;;  %v3996_v38 = vmax.f32 %v3740_v14, 0.0  ;;  %v4124_v44 = vmax.f32 %v3868_v35, 0.0  ;;  %v3741_v62 = vadd.f32 %v5575_v41, %v1644_v10  ;;  %v3869_v54 = vadd.f32 %v3504_v4, %v1964_v39  ;;  %v3529_v47 = vpop.permute.xlu0 %3528 }
 0x157   : > { %v1648_v30 = vpop.f32.mrf.mxu0  ;;  %v1968_v19 = vpop.f32.mrf.mxu1 }
 0x158   : > { %4252 = vst [vmem:[%s5736_s8 + $0x1b0] sm:$0xff] %v3996_v38  ;;  %4380 = vst [vmem:[%s5736_s8 + $0x5b0] sm:$0xff] %v4124_v44  ;;  %v3997_v46 = vmax.f32 %v3741_v62, 0.0  ;;  %v4125_v63 = vmax.f32 %v3869_v54, 0.0  ;;  %v3742_v2 = vadd.f32 %v5591_v50, %v1648_v30  ;;  %v3870_v32 = vadd.f32 %v3509_v18, %v1968_v19  ;;  %v3534_v19 = vpop.permute.xlu1 %3533 }
 0x159   : > { %v1650_v0 = vpop.f32.mrf.mxu0  ;;  %v1970_v48 = vpop.f32.mrf.mxu1 }
 0x15a   : > { %4253 = vst [vmem:[%s5736_s8 + $0x1b8] sm:$0xff] %v3997_v46  ;;  %4381 = vst [vmem:[%s5736_s8 + $0x5b8] sm:$0xff] %v4125_v63  ;;  %v3998_v45 = vmax.f32 %v3742_v2, 0.0  ;;  %v4126_v41 = vmax.f32 %v3870_v32, 0.0  ;;  %v3743_v51 = vadd.f32 %v5591_v50, %v1650_v0  ;;  %v3871_v6 = vadd.f32 %v3509_v18, %v1970_v48 }
 0x15b   : > { %v1652_v13 = vpop.f32.mrf.mxu0  ;;  %v1972_v29 = vpop.f32.mrf.mxu1 }
 0x15c   : > { %4254 = vst [vmem:[%s5736_s8 + $0x1c0] sm:$0xff] %v3998_v45  ;;  %4382 = vst [vmem:[%s5736_s8 + $0x5c0] sm:$0xff] %v4126_v41  ;;  %v3999_v11 = vmax.f32 %v3743_v51, 0.0  ;;  %v4127_v58 = vmax.f32 %v3871_v6, 0.0  ;;  %v3744_v56 = vadd.f32 %v5589_v49, %v1652_v13  ;;  %v3872_v3 = vadd.f32 %v3514_v53, %v1972_v29  ;;  %v3539_v13 = vpop.permute.xlu0 %3538 }
 0x15d   : > { %v1654_v9 = vpop.f32.mrf.mxu0  ;;  %v1974_v55 = vpop.f32.mrf.mxu1 }
 0x15e   : > { %4255 = vst [vmem:[%s5736_s8 + $0x1c8] sm:$0xff] %v3999_v11  ;;  %4383 = vst [vmem:[%s5736_s8 + $0x5c8] sm:$0xff] %v4127_v58  ;;  %v4000_v16 = vmax.f32 %v3744_v56, 0.0  ;;  %v4128_v50 = vmax.f32 %v3872_v3, 0.0  ;;  %v3745_v25 = vadd.f32 %v5589_v49, %v1654_v9  ;;  %v3873_v42 = vadd.f32 %v3514_v53, %v1974_v55 }
 0x15f   : > { %v1658_v27 = vpop.f32.mrf.mxu0  ;;  %v1978_v26 = vpop.f32.mrf.mxu1 }
 0x160   : > { %4256 = vst [vmem:[%s5736_s8 + $0x1d0] sm:$0xff] %v4000_v16  ;;  %4384 = vst [vmem:[%s5736_s8 + $0x5d0] sm:$0xff] %v4128_v50  ;;  %v4001_v34 = vmax.f32 %v3745_v25, 0.0  ;;  %v4129_v17 = vmax.f32 %v3873_v42, 0.0  ;;  %v3746_v21 = vadd.f32 %v5607_v60, %v1658_v27  ;;  %v3874_v22 = vadd.f32 %v3519_v24, %v1978_v26  ;;  %v3544_v42 = vpop.permute.xlu1 %3543 }
 0x161   : > { %v1660_v28 = vpop.f32.mrf.mxu0  ;;  %v1980_v43 = vpop.f32.mrf.mxu1 }
 0x162   : > { %4257 = vst [vmem:[%s5736_s8 + $0x1d8] sm:$0xff] %v4001_v34  ;;  %4385 = vst [vmem:[%s5736_s8 + $0x5d8] sm:$0xff] %v4129_v17  ;;  %v4002_v52 = vmax.f32 %v3746_v21, 0.0  ;;  %v4130_v49 = vmax.f32 %v3874_v22, 0.0  ;;  %v3747_v20 = vadd.f32 %v5607_v60, %v1660_v28  ;;  %v3875_v37 = vadd.f32 %v3519_v24, %v1980_v43 }
 0x163   : > { %v1662_v7 = vpop.f32.mrf.mxu0  ;;  %v1982_v4 = vpop.f32.mrf.mxu1 }
 0x164   : > { %4258 = vst [vmem:[%s5736_s8 + $0x1e0] sm:$0xff] %v4002_v52  ;;  %4386 = vst [vmem:[%s5736_s8 + $0x5e0] sm:$0xff] %v4130_v49  ;;  %v4003_v23 = vmax.f32 %v3747_v20, 0.0  ;;  %v4131_v33 = vmax.f32 %v3875_v37, 0.0  ;;  %v3748_v31 = vadd.f32 %v5605_v59, %v1662_v7  ;;  %v3876_v8 = vadd.f32 %v3524_v57, %v1982_v4  ;;  %v3549_v20 = vpop.permute.xlu0 %3548 }
 0x165   : > { %v1664_v40 = vpop.f32.mrf.mxu0  ;;  %v1984_v61 = vpop.f32.mrf.mxu1 }
 0x166   : > { %4259 = vst [vmem:[%s5736_s8 + $0x1e8] sm:$0xff] %v4003_v23  ;;  %4387 = vst [vmem:[%s5736_s8 + $0x5e8] sm:$0xff] %v4131_v33  ;;  %v4004_v36 = vmax.f32 %v3748_v31, 0.0  ;;  %v4132_v60 = vmax.f32 %v3876_v8, 0.0  ;;  %v3749_v14 = vadd.f32 %v5605_v59, %v1664_v40  ;;  %v3877_v35 = vadd.f32 %v3524_v57, %v1984_v61  ;;  %v6483_v40 = vld [vmem:[#allocation7_spill] sm:$0xff] }
 0x167   : > { %v1668_v10 = vpop.f32.mrf.mxu0  ;;  %v1988_v39 = vpop.f32.mrf.mxu1 }
 0x168   : > { %4260 = vst [vmem:[%s5736_s8 + $0x1f0] sm:$0xff] %v4004_v36  ;;  %4388 = vst [vmem:[%s5736_s8 + $0x5f0] sm:$0xff] %v4132_v60  ;;  %v4005_v18 = vmax.f32 %v3749_v14, 0.0  ;;  %v4133_v38 = vmax.f32 %v3877_v35, 0.0  ;;  %v3750_v44 = vadd.f32 %v5621_v5, %v1668_v10  ;;  %v3878_v62 = vadd.f32 %v3529_v47, %v1988_v39  ;;  %v3554_v14 = vpop.permute.xlu1 %3553 }
 0x169   : > { %v1670_v54 = vpop.f32.mrf.mxu0  ;;  %v1990_v30 = vpop.f32.mrf.mxu1 }
 0x16a   : > { %4261 = vst [vmem:[%s5736_s8 + $0x1f8] sm:$0xff] %v4005_v18  ;;  %4389 = vst [vmem:[%s5736_s8 + $0x5f8] sm:$0xff] %v4133_v38  ;;  %v4006_v46 = vmax.f32 %v3750_v44, 0.0  ;;  %v4134_v59 = vmax.f32 %v3878_v62, 0.0  ;;  %v3751_v63 = vadd.f32 %v5621_v5, %v1670_v54  ;;  %v3879_v2 = vadd.f32 %v3529_v47, %v1990_v30  ;;  %v6484_v54 = vld [vmem:[#allocation6_spill] sm:$0xff] }
 0x16b   : > { %v1672_v32 = vpop.f32.mrf.mxu0  ;;  %v1992_v0 = vpop.f32.mrf.mxu1 }
 0x16c   : > { %4262 = vst [vmem:[%s5736_s8 + $0x200] sm:$0xff] %v4006_v46  ;;  %4390 = vst [vmem:[%s5736_s8 + $0x600] sm:$0xff] %v4134_v59  ;;  %v4007_v48 = vmax.f32 %v3751_v63, 0.0  ;;  %v4135_v53 = vmax.f32 %v3879_v2, 0.0  ;;  %v3752_v45 = vadd.f32 %v5619_v1, %v1672_v32  ;;  %v3880_v41 = vadd.f32 %v3534_v19, %v1992_v0  ;;  %v3559_v63 = vpop.permute.xlu0 %3558 }
 0x16d   : > { %v1674_v51 = vpop.f32.mrf.mxu0  ;;  %v1994_v6 = vpop.f32.mrf.mxu1 }
 0x16e   : > { %4263 = vst [vmem:[%s5736_s8 + $0x208] sm:$0xff] %v4007_v48  ;;  %4391 = vst [vmem:[%s5736_s8 + $0x608] sm:$0xff] %v4135_v53  ;;  %v4008_v29 = vmax.f32 %v3752_v45, 0.0  ;;  %v4136_v5 = vmax.f32 %v3880_v41, 0.0  ;;  %v3753_v11 = vadd.f32 %v5619_v1, %v1674_v51  ;;  %v3881_v58 = vadd.f32 %v3534_v19, %v1994_v6  ;;  %v6485_v6 = vld [vmem:[#allocation9_spill] sm:$0xff] }
 0x16f   : > { %v1678_v56 = vpop.f32.mrf.mxu0  ;;  %v1998_v3 = vpop.f32.mrf.mxu1 }
 0x170   : > { %4264 = vst [vmem:[%s5736_s8 + $0x210] sm:$0xff] %v4008_v29  ;;  %4392 = vst [vmem:[%s5736_s8 + $0x610] sm:$0xff] %v4136_v5  ;;  %v4009_v9 = vmax.f32 %v3753_v11, 0.0  ;;  %v4137_v55 = vmax.f32 %v3881_v58, 0.0  ;;  %v3754_v24 = vadd.f32 %v5637_v15, %v1678_v56  ;;  %v3882_v16 = vadd.f32 %v3539_v13, %v1998_v3  ;;  %v3564_v58 = vpop.permute.xlu1 %3563 }
 0x171   : > { %v1680_v50 = vpop.f32.mrf.mxu0  ;;  %v2000_v25 = vpop.f32.mrf.mxu1 }
 0x172   : > { %4265 = vst [vmem:[%s5736_s8 + $0x218] sm:$0xff] %v4009_v9  ;;  %4393 = vst [vmem:[%s5736_s8 + $0x618] sm:$0xff] %v4137_v55  ;;  %v4010_v27 = vmax.f32 %v3754_v24, 0.0  ;;  %v4138_v1 = vmax.f32 %v3882_v16, 0.0  ;;  %v3755_v26 = vadd.f32 %v5637_v15, %v1680_v50  ;;  %v3883_v34 = vadd.f32 %v3539_v13, %v2000_v25 }
 0x173   : > { %v1682_v17 = vpop.f32.mrf.mxu0  ;;  %v2002_v21 = vpop.f32.mrf.mxu1 }
 0x174   : > { %4266 = vst [vmem:[%s5736_s8 + $0x220] sm:$0xff] %v4010_v27  ;;  %4394 = vst [vmem:[%s5736_s8 + $0x620] sm:$0xff] %v4138_v1  ;;  %v4011_v22 = vmax.f32 %v3755_v26, 0.0  ;;  %v4139_v28 = vmax.f32 %v3883_v34, 0.0  ;;  %v3756_v43 = vadd.f32 %v5635_v12, %v1682_v17  ;;  %v3884_v57 = vadd.f32 %v3544_v42, %v2002_v21  ;;  %v3569_v17 = vpop.permute.xlu0 %3568 }
 0x175   : > { %v1684_v52 = vpop.f32.mrf.mxu0  ;;  %v2004_v49 = vpop.f32.mrf.mxu1 }
 0x176   : > { %4267 = vst [vmem:[%s5736_s8 + $0x228] sm:$0xff] %v4011_v22  ;;  %4395 = vst [vmem:[%s5736_s8 + $0x628] sm:$0xff] %v4139_v28  ;;  %v4012_v37 = vmax.f32 %v3756_v43, 0.0  ;;  %v4140_v15 = vmax.f32 %v3884_v57, 0.0  ;;  %v3757_v7 = vadd.f32 %v5635_v12, %v1684_v52  ;;  %v3885_v4 = vadd.f32 %v3544_v42, %v2004_v49  ;;  %v6486_v42 = vld [vmem:[#allocation8_spill] sm:$0xff] }
 0x177   : > { %v1688_v23 = vpop.f32.mrf.mxu0  ;;  %v2008_v33 = vpop.f32.mrf.mxu1 }
 0x178   : > { %4268 = vst [vmem:[%s5736_s8 + $0x230] sm:$0xff] %v4012_v37  ;;  %4396 = vst [vmem:[%s5736_s8 + $0x630] sm:$0xff] %v4140_v15  ;;  %v4013_v31 = vmax.f32 %v3757_v7, 0.0  ;;  %v4141_v8 = vmax.f32 %v3885_v4, 0.0  ;;  %v3758_v61 = vadd.f32 %v6483_v40, %v1688_v23  ;;  %v3886_v47 = vadd.f32 %v3549_v20, %v2008_v33  ;;  %v6487_v37 = vld [vmem:[#allocation11_spill] sm:$0xff]  ;;  %v3574_v33 = vpop.permute.xlu1 %3573 }
 0x179   : > { %v1690_v36 = vpop.f32.mrf.mxu0  ;;  %v2010_v60 = vpop.f32.mrf.mxu1 }
 0x17a   : > { %4269 = vst [vmem:[%s5736_s8 + $0x238] sm:$0xff] %v4013_v31  ;;  %4397 = vst [vmem:[%s5736_s8 + $0x638] sm:$0xff] %v4141_v8  ;;  %v4014_v35 = vmax.f32 %v3758_v61, 0.0  ;;  %v4142_v12 = vmax.f32 %v3886_v47, 0.0  ;;  %v3759_v10 = vadd.f32 %v6483_v40, %v1690_v36  ;;  %v3887_v39 = vadd.f32 %v3549_v20, %v2010_v60 }
 0x17b   : > { %v1692_v18 = vpop.f32.mrf.mxu0  ;;  %v2012_v38 = vpop.f32.mrf.mxu1 }
 0x17c   : > { %4270 = vst [vmem:[%s5736_s8 + $0x240] sm:$0xff] %v4014_v35  ;;  %4398 = vst [vmem:[%s5736_s8 + $0x640] sm:$0xff] %v4142_v12  ;;  %v4015_v44 = vmax.f32 %v3759_v10, 0.0  ;;  %v4143_v62 = vmax.f32 %v3887_v39, 0.0  ;;  %v3760_v30 = vadd.f32 %v6484_v54, %v1692_v18  ;;  %v3888_v19 = vadd.f32 %v3554_v14, %v2012_v38  ;;  %v6488_v35 = vld [vmem:[#allocation10_spill] sm:$0xff]  ;;  %v3579_v38 = vpop.permute.xlu0 %3578 }
 0x17d   : > { %v1694_v46 = vpop.f32.mrf.mxu0  ;;  %v2014_v59 = vpop.f32.mrf.mxu1 }
 0x17e   : > { %4271 = vst [vmem:[%s5736_s8 + $0x248] sm:$0xff] %v4015_v44  ;;  %4399 = vst [vmem:[%s5736_s8 + $0x648] sm:$0xff] %v4143_v62  ;;  %v4016_v2 = vmax.f32 %v3760_v30, 0.0  ;;  %v4144_v32 = vmax.f32 %v3888_v19, 0.0  ;;  %v3761_v0 = vadd.f32 %v6484_v54, %v1694_v46  ;;  %v3889_v48 = vadd.f32 %v3554_v14, %v2014_v59 }
 0x17f   : > { %v1698_v53 = vpop.f32.mrf.mxu0  ;;  %v2018_v45 = vpop.f32.mrf.mxu1 }
 0x180   : > { %4272 = vst [vmem:[%s5736_s8 + $0x250] sm:$0xff] %v4016_v2  ;;  %4400 = vst [vmem:[%s5736_s8 + $0x650] sm:$0xff] %v4144_v32  ;;  %v4017_v41 = vmax.f32 %v3761_v0, 0.0  ;;  %v4145_v51 = vmax.f32 %v3889_v48, 0.0  ;;  %v3762_v13 = vadd.f32 %v6485_v6, %v1698_v53  ;;  %v3890_v29 = vadd.f32 %v3559_v63, %v2018_v45  ;;  %v6489_v2 = vld [vmem:[#allocation13_spill] sm:$0xff]  ;;  %v3584_v45 = vpop.permute.xlu1 %3583 }
 0x181   : > { %v1700_v5 = vpop.f32.mrf.mxu0  ;;  %v2020_v11 = vpop.f32.mrf.mxu1 }
 0x182   : > { %4273 = vst [vmem:[%s5736_s8 + $0x258] sm:$0xff] %v4017_v41  ;;  %4401 = vst [vmem:[%s5736_s8 + $0x658] sm:$0xff] %v4145_v51  ;;  %v4018_v56 = vmax.f32 %v3762_v13, 0.0  ;;  %v4146_v3 = vmax.f32 %v3890_v29, 0.0  ;;  %v3763_v9 = vadd.f32 %v6485_v6, %v1700_v5  ;;  %v3891_v55 = vadd.f32 %v3559_v63, %v2020_v11 }
 0x183   : > { %v1702_v24 = vpop.f32.mrf.mxu0  ;;  %v2022_v16 = vpop.f32.mrf.mxu1 }
 0x184   : > { %4274 = vst [vmem:[%s5736_s8 + $0x260] sm:$0xff] %v4018_v56  ;;  %4402 = vst [vmem:[%s5736_s8 + $0x660] sm:$0xff] %v4146_v3  ;;  %v4019_v50 = vmax.f32 %v3763_v9, 0.0  ;;  %v4147_v25 = vmax.f32 %v3891_v55, 0.0  ;;  %v3764_v27 = vadd.f32 %v6486_v42, %v1702_v24  ;;  %v3892_v1 = vadd.f32 %v3564_v58, %v2022_v16  ;;  %v6490_v56 = vld [vmem:[#allocation12_spill] sm:$0xff]  ;;  %v3589_v16 = vpop.permute.xlu0 %3588 }
 0x185   : > { %v1704_v26 = vpop.f32.mrf.mxu0  ;;  %v2024_v34 = vpop.f32.mrf.mxu1 }
 0x186   : > { %4275 = vst [vmem:[%s5736_s8 + $0x268] sm:$0xff] %v4019_v50  ;;  %4403 = vst [vmem:[%s5736_s8 + $0x668] sm:$0xff] %v4147_v25  ;;  %v4020_v21 = vmax.f32 %v3764_v27, 0.0  ;;  %v4148_v22 = vmax.f32 %v3892_v1, 0.0  ;;  %v3765_v28 = vadd.f32 %v6486_v42, %v1704_v26  ;;  %v3893_v43 = vadd.f32 %v3564_v58, %v2024_v34 }
 0x187   : > { %v1708_v57 = vpop.f32.mrf.mxu0  ;;  %v2028_v52 = vpop.f32.mrf.mxu1 }
 0x188   : > { %4276 = vst [vmem:[%s5736_s8 + $0x270] sm:$0xff] %v4020_v21  ;;  %4404 = vst [vmem:[%s5736_s8 + $0x670] sm:$0xff] %v4148_v22  ;;  %v4021_v49 = vmax.f32 %v3765_v28, 0.0  ;;  %v4149_v20 = vmax.f32 %v3893_v43, 0.0  ;;  %v3766_v15 = vadd.f32 %v6487_v37, %v1708_v57  ;;  %v3894_v7 = vadd.f32 %v3569_v17, %v2028_v52  ;;  %v6491_v21 = vld [vmem:[#allocation15_spill] sm:$0xff]  ;;  %v3594_v52 = vpop.permute.xlu1 %3593 }
 0x189   : > { %v1710_v4 = vpop.f32.mrf.mxu0  ;;  %v2030_v23 = vpop.f32.mrf.mxu1 }
 0x18a   : > { %4277 = vst [vmem:[%s5736_s8 + $0x278] sm:$0xff] %v4021_v49  ;;  %4405 = vst [vmem:[%s5736_s8 + $0x678] sm:$0xff] %v4149_v20  ;;  %v4022_v31 = vmax.f32 %v3766_v15, 0.0  ;;  %v4150_v8 = vmax.f32 %v3894_v7, 0.0  ;;  %v3767_v40 = vadd.f32 %v6487_v37, %v1710_v4  ;;  %v3895_v61 = vadd.f32 %v3569_v17, %v2030_v23 }
 0x18b   : > { %v1712_v47 = vpop.f32.mrf.mxu0  ;;  %v2032_v36 = vpop.f32.mrf.mxu1 }
 0x18c   : > { %4278 = vst [vmem:[%s5736_s8 + $0x280] sm:$0xff] %v4022_v31  ;;  %4406 = vst [vmem:[%s5736_s8 + $0x680] sm:$0xff] %v4150_v8  ;;  %v4023_v60 = vmax.f32 %v3767_v40, 0.0  ;;  %v4151_v14 = vmax.f32 %v3895_v61, 0.0  ;;  %v3768_v12 = vadd.f32 %v6488_v35, %v1712_v47  ;;  %v3896_v10 = vadd.f32 %v3574_v33, %v2032_v36  ;;  %v6492_v31 = vld [vmem:[#allocation14_spill] sm:$0xff]  ;;  %v3599_v36 = vpop.permute.xlu0 %3598 }
 0x18d   : > { %v1714_v39 = vpop.f32.mrf.mxu0  ;;  %v2034_v18 = vpop.f32.mrf.mxu1 }
 0x18e   : > { %4279 = vst [vmem:[%s5736_s8 + $0x288] sm:$0xff] %v4023_v60  ;;  %4407 = vst [vmem:[%s5736_s8 + $0x688] sm:$0xff] %v4151_v14  ;;  %v4024_v44 = vmax.f32 %v3768_v12, 0.0  ;;  %v4152_v62 = vmax.f32 %v3896_v10, 0.0  ;;  %v3769_v54 = vadd.f32 %v6488_v35, %v1714_v39  ;;  %v3897_v30 = vadd.f32 %v3574_v33, %v2034_v18 }
 0x18f   : > { %v1718_v19 = vpop.f32.mrf.mxu0  ;;  %v2038_v46 = vpop.f32.mrf.mxu1 }
 0x190   : > { %4280 = vst [vmem:[%s5736_s8 + $0x290] sm:$0xff] %v4024_v44  ;;  %4408 = vst [vmem:[%s5736_s8 + $0x690] sm:$0xff] %v4152_v62  ;;  %v4025_v59 = vmax.f32 %v3769_v54, 0.0  ;;  %v4153_v63 = vmax.f32 %v3897_v30, 0.0  ;;  %v3770_v32 = vadd.f32 %v6489_v2, %v1718_v19  ;;  %v3898_v0 = vadd.f32 %v3579_v38, %v2038_v46  ;;  %v6493_v44 = vld [vmem:[#allocation17_spill] sm:$0xff]  ;;  %v3604_v46 = vpop.permute.xlu1 %3603 }
 0x191   : > { %v1720_v48 = vpop.f32.mrf.mxu0  ;;  %v2040_v53 = vpop.f32.mrf.mxu1 }
 0x192   : > { %4281 = vst [vmem:[%s5736_s8 + $0x298] sm:$0xff] %v4025_v59  ;;  %4409 = vst [vmem:[%s5736_s8 + $0x698] sm:$0xff] %v4153_v63  ;;  %v4026_v41 = vmax.f32 %v3770_v32, 0.0  ;;  %v4154_v51 = vmax.f32 %v3898_v0, 0.0  ;;  %v3771_v6 = vadd.f32 %v6489_v2, %v1720_v48  ;;  %v3899_v13 = vadd.f32 %v3579_v38, %v2040_v53 }
 0x193   : > { %v1722_v29 = vpop.f32.mrf.mxu0  ;;  %v2042_v5 = vpop.f32.mrf.mxu1 }
 0x194   : > { %4282 = vst [vmem:[%s5736_s8 + $0x2a0] sm:$0xff] %v4026_v41  ;;  %4410 = vst [vmem:[%s5736_s8 + $0x6a0] sm:$0xff] %v4154_v51  ;;  %v4027_v11 = vmax.f32 %v3771_v6, 0.0  ;;  %v4155_v58 = vmax.f32 %v3899_v13, 0.0  ;;  %v3772_v3 = vadd.f32 %v6490_v56, %v1722_v29  ;;  %v3900_v9 = vadd.f32 %v3584_v45, %v2042_v5  ;;  %v6494_v41 = vld [vmem:[#allocation16_spill] sm:$0xff]  ;;  %v3609_v5 = vpop.permute.xlu0 %3608 }
 0x195   : > { %v1724_v55 = vpop.f32.mrf.mxu0  ;;  %v2044_v24 = vpop.f32.mrf.mxu1 }
 0x196   : > { %4283 = vst [vmem:[%s5736_s8 + $0x2a8] sm:$0xff] %v4027_v11  ;;  %4411 = vst [vmem:[%s5736_s8 + $0x6a8] sm:$0xff] %v4155_v58  ;;  %v4028_v50 = vmax.f32 %v3772_v3, 0.0  ;;  %v4156_v25 = vmax.f32 %v3900_v9, 0.0  ;;  %v3773_v42 = vadd.f32 %v6490_v56, %v1724_v55  ;;  %v3901_v27 = vadd.f32 %v3584_v45, %v2044_v24 }
 0x197   : > { %v1728_v1 = vpop.f32.mrf.mxu0  ;;  %v2048_v26 = vpop.f32.mrf.mxu1 }
 0x198   : > { %4284 = vst [vmem:[%s5736_s8 + $0x2b0] sm:$0xff] %v4028_v50  ;;  %4412 = vst [vmem:[%s5736_s8 + $0x6b0] sm:$0xff] %v4156_v25  ;;  %v4029_v34 = vmax.f32 %v3773_v42, 0.0  ;;  %v4157_v17 = vmax.f32 %v3901_v27, 0.0  ;;  %v3774_v22 = vadd.f32 %v6491_v21, %v1728_v1  ;;  %v3902_v28 = vadd.f32 %v3589_v16, %v2048_v26  ;;  %v6495_v50 = vld [vmem:[#allocation19_spill] sm:$0xff]  ;;  %v3614_v26 = vpop.permute.xlu1 %3613 }
 0x199   : > { %v1730_v43 = vpop.f32.mrf.mxu0  ;;  %v2050_v57 = vpop.f32.mrf.mxu1 }
 0x19a   : > { %4285 = vst [vmem:[%s5736_s8 + $0x2b8] sm:$0xff] %v4029_v34  ;;  %4413 = vst [vmem:[%s5736_s8 + $0x6b8] sm:$0xff] %v4157_v17  ;;  %v4030_v49 = vmax.f32 %v3774_v22, 0.0  ;;  %v4158_v20 = vmax.f32 %v3902_v28, 0.0  ;;  %v3775_v37 = vadd.f32 %v6491_v21, %v1730_v43  ;;  %v3903_v15 = vadd.f32 %v3589_v16, %v2050_v57 }
 0x19b   : > { %v1732_v7 = vpop.f32.mrf.mxu0  ;;  %v2052_v4 = vpop.f32.mrf.mxu1 }
 0x19c   : > { %4286 = vst [vmem:[%s5736_s8 + $0x2c0] sm:$0xff] %v4030_v49  ;;  %4414 = vst [vmem:[%s5736_s8 + $0x6c0] sm:$0xff] %v4158_v20  ;;  %v4031_v23 = vmax.f32 %v3775_v37, 0.0  ;;  %v4159_v33 = vmax.f32 %v3903_v15, 0.0  ;;  %v3776_v8 = vadd.f32 %v6492_v31, %v1732_v7  ;;  %v3904_v40 = vadd.f32 %v3594_v52, %v2052_v4  ;;  %v6496_v49 = vld [vmem:[#allocation18_spill] sm:$0xff]  ;;  %v3619_v4 = vpop.permute.xlu0 %3618 }
 0x19d   : > { %v1734_v61 = vpop.f32.mrf.mxu0  ;;  %v2054_v47 = vpop.f32.mrf.mxu1 }
 0x19e   : > { %4287 = vst [vmem:[%s5736_s8 + $0x2c8] sm:$0xff] %v4031_v23  ;;  %4415 = vst [vmem:[%s5736_s8 + $0x6c8] sm:$0xff] %v4159_v33  ;;  %v4032_v60 = vmax.f32 %v3776_v8, 0.0  ;;  %v4160_v14 = vmax.f32 %v3904_v40, 0.0  ;;  %v3777_v35 = vadd.f32 %v6492_v31, %v1734_v61  ;;  %v3905_v12 = vadd.f32 %v3594_v52, %v2054_v47 }
 0x19f   : > { %v1738_v10 = vpop.f32.mrf.mxu0  ;;  %v2058_v39 = vpop.f32.mrf.mxu1 }
 0x1a0   : > { %4288 = vst [vmem:[%s5736_s8 + $0x2d0] sm:$0xff] %v4032_v60  ;;  %4416 = vst [vmem:[%s5736_s8 + $0x6d0] sm:$0xff] %v4160_v14  ;;  %v4033_v18 = vmax.f32 %v3777_v35, 0.0  ;;  %v4161_v38 = vmax.f32 %v3905_v12, 0.0  ;;  %v3778_v62 = vadd.f32 %v6493_v44, %v1738_v10  ;;  %v3906_v54 = vadd.f32 %v3599_v36, %v2058_v39  ;;  %v6497_v60 = vld [vmem:[#allocation21_spill] sm:$0xff]  ;;  %v3624_v39 = vpop.permute.xlu1 %3623 }
 0x1a1   : > { %v1740_v30 = vpop.f32.mrf.mxu0  ;;  %v2060_v19 = vpop.f32.mrf.mxu1 }
 0x1a2   : > { %4289 = vst [vmem:[%s5736_s8 + $0x2d8] sm:$0xff] %v4033_v18  ;;  %4417 = vst [vmem:[%s5736_s8 + $0x6d8] sm:$0xff] %v4161_v38  ;;  %v4034_v59 = vmax.f32 %v3778_v62, 0.0  ;;  %v4162_v63 = vmax.f32 %v3906_v54, 0.0  ;;  %v3779_v2 = vadd.f32 %v6493_v44, %v1740_v30  ;;  %v3907_v32 = vadd.f32 %v3599_v36, %v2060_v19 }
 0x1a3   : > { %v1742_v0 = vpop.f32.mrf.mxu0  ;;  %v2062_v48 = vpop.f32.mrf.mxu1 }
 0x1a4   : > { %4290 = vst [vmem:[%s5736_s8 + $0x2e0] sm:$0xff] %v4034_v59  ;;  %4418 = vst [vmem:[%s5736_s8 + $0x6e0] sm:$0xff] %v4162_v63  ;;  %v4035_v53 = vmax.f32 %v3779_v2, 0.0  ;;  %v4163_v45 = vmax.f32 %v3907_v32, 0.0  ;;  %v3780_v51 = vadd.f32 %v6494_v41, %v1742_v0  ;;  %v3908_v6 = vadd.f32 %v3604_v46, %v2062_v48  ;;  %v6498_v59 = vld [vmem:[#allocation20_spill] sm:$0xff]  ;;  %v3629_v48 = vpop.permute.xlu0 %3628 }
 0x1a5   : > { %v1744_v13 = vpop.f32.mrf.mxu0  ;;  %v2064_v29 = vpop.f32.mrf.mxu1 }
 0x1a6   : > { %4291 = vst [vmem:[%s5736_s8 + $0x2e8] sm:$0xff] %v4035_v53  ;;  %4419 = vst [vmem:[%s5736_s8 + $0x6e8] sm:$0xff] %v4163_v45  ;;  %v4036_v11 = vmax.f32 %v3780_v51, 0.0  ;;  %v4164_v58 = vmax.f32 %v3908_v6, 0.0  ;;  %v3781_v56 = vadd.f32 %v6494_v41, %v1744_v13  ;;  %v3909_v3 = vadd.f32 %v3604_v46, %v2064_v29 }
 0x1a7   : > { %v1748_v9 = vpop.f32.mrf.mxu0  ;;  %v2068_v55 = vpop.f32.mrf.mxu1 }
 0x1a8   : > { %4292 = vst [vmem:[%s5736_s8 + $0x2f0] sm:$0xff] %v4036_v11  ;;  %4420 = vst [vmem:[%s5736_s8 + $0x6f0] sm:$0xff] %v4164_v58  ;;  %v4037_v24 = vmax.f32 %v3781_v56, 0.0  ;;  %v4165_v16 = vmax.f32 %v3909_v3, 0.0  ;;  %v3782_v25 = vadd.f32 %v6495_v50, %v1748_v9  ;;  %v3910_v42 = vadd.f32 %v3609_v5, %v2068_v55  ;;  %v6499_v11 = vld [vmem:[#allocation23_spill] sm:$0xff]  ;;  %v3634_v55 = vpop.permute.xlu1 %3633 }
 0x1a9   : > { %v1750_v27 = vpop.f32.mrf.mxu0  ;;  %v2070_v1 = vpop.f32.mrf.mxu1 }
 0x1aa   : > { %4293 = vst [vmem:[%s5736_s8 + $0x2f8] sm:$0xff] %v4037_v24  ;;  %4421 = vst [vmem:[%s5736_s8 + $0x6f8] sm:$0xff] %v4165_v16  ;;  %v4038_v34 = vmax.f32 %v3782_v25, 0.0  ;;  %v4166_v17 = vmax.f32 %v3910_v42, 0.0  ;;  %v3783_v21 = vadd.f32 %v6495_v50, %v1750_v27  ;;  %v3911_v22 = vadd.f32 %v3609_v5, %v2070_v1 }
 0x1ab   : > { %v1752_v28 = vpop.f32.mrf.mxu0  ;;  %v2072_v43 = vpop.f32.mrf.mxu1 }
 0x1ac   : > { %4294 = vst [vmem:[%s5736_s8 + $0x300] sm:$0xff] %v4038_v34  ;;  %4422 = vst [vmem:[%s5736_s8 + $0x700] sm:$0xff] %v4166_v17  ;;  %v4039_v57 = vmax.f32 %v3783_v21, 0.0  ;;  %v4167_v52 = vmax.f32 %v3911_v22, 0.0  ;;  %v3784_v20 = vadd.f32 %v6496_v49, %v1752_v28  ;;  %v3912_v37 = vadd.f32 %v3614_v26, %v2072_v43  ;;  %v6500_v34 = vld [vmem:[#allocation22_spill] sm:$0xff]  ;;  %v3639_v43 = vpop.permute.xlu0 %3638 }
 0x1ad   : > { %v1754_v15 = vpop.f32.mrf.mxu0  ;;  %v2074_v7 = vpop.f32.mrf.mxu1 }
 0x1ae   : > { %4295 = vst [vmem:[%s5736_s8 + $0x308] sm:$0xff] %v4039_v57  ;;  %4423 = vst [vmem:[%s5736_s8 + $0x708] sm:$0xff] %v4167_v52  ;;  %v4040_v23 = vmax.f32 %v3784_v20, 0.0  ;;  %v4168_v33 = vmax.f32 %v3912_v37, 0.0  ;;  %v3785_v31 = vadd.f32 %v6496_v49, %v1754_v15  ;;  %v3913_v8 = vadd.f32 %v3614_v26, %v2074_v7 }
 0x1af   : > { %v1758_v40 = vpop.f32.mrf.mxu0  ;;  %v2078_v61 = vpop.f32.mrf.mxu1 }
 0x1b0   : > { %4296 = vst [vmem:[%s5736_s8 + $0x310] sm:$0xff] %v4040_v23  ;;  %4424 = vst [vmem:[%s5736_s8 + $0x710] sm:$0xff] %v4168_v33  ;;  %v4041_v47 = vmax.f32 %v3785_v31, 0.0  ;;  %v4169_v36 = vmax.f32 %v3913_v8, 0.0  ;;  %v3786_v14 = vadd.f32 %v6497_v60, %v1758_v40  ;;  %v3914_v35 = vadd.f32 %v3619_v4, %v2078_v61  ;;  %v6501_v23 = vld [vmem:[#allocation25_spill] sm:$0xff]  ;;  %v3644_v61 = vpop.permute.xlu1 %3643 }
 0x1b1   : > { %v1760_v12 = vpop.f32.mrf.mxu0  ;;  %v2080_v10 = vpop.f32.mrf.mxu1 }
 0x1b2   : > { %4297 = vst [vmem:[%s5736_s8 + $0x318] sm:$0xff] %v4041_v47  ;;  %4425 = vst [vmem:[%s5736_s8 + $0x718] sm:$0xff] %v4169_v36  ;;  %v4042_v18 = vmax.f32 %v3786_v14, 0.0  ;;  %v4170_v38 = vmax.f32 %v3914_v35, 0.0  ;;  %v3787_v44 = vadd.f32 %v6497_v60, %v1760_v12  ;;  %v3915_v62 = vadd.f32 %v3619_v4, %v2080_v10 }
 0x1b3   : > { %v1762_v54 = vpop.f32.mrf.mxu0  ;;  %v2082_v30 = vpop.f32.mrf.mxu1 }
 0x1b4   : > { %4298 = vst [vmem:[%s5736_s8 + $0x320] sm:$0xff] %v4042_v18  ;;  %4426 = vst [vmem:[%s5736_s8 + $0x720] sm:$0xff] %v4170_v38  ;;  %v4043_v19 = vmax.f32 %v3787_v44, 0.0  ;;  %v4171_v46 = vmax.f32 %v3915_v62, 0.0  ;;  %v3788_v63 = vadd.f32 %v6498_v59, %v1762_v54  ;;  %v3916_v2 = vadd.f32 %v3624_v39, %v2082_v30  ;;  %v6502_v18 = vld [vmem:[#allocation24_spill] sm:$0xff]  ;;  %v3649_v30 = vpop.permute.xlu0 %3648 }
 0x1b5   : > { %v1764_v32 = vpop.f32.mrf.mxu0  ;;  %v2084_v0 = vpop.f32.mrf.mxu1 }
 0x1b6   : > { %4299 = vst [vmem:[%s5736_s8 + $0x328] sm:$0xff] %v4043_v19  ;;  %4427 = vst [vmem:[%s5736_s8 + $0x728] sm:$0xff] %v4171_v46  ;;  %v4044_v53 = vmax.f32 %v3788_v63, 0.0  ;;  %v4172_v45 = vmax.f32 %v3916_v2, 0.0  ;;  %v3789_v41 = vadd.f32 %v6498_v59, %v1764_v32  ;;  %v3917_v51 = vadd.f32 %v3624_v39, %v2084_v0 }
 0x1b7   : > { %v1768_v6 = vpop.f32.mrf.mxu0  ;;  %v2088_v13 = vpop.f32.mrf.mxu1 }
 0x1b8   : > { %4300 = vst [vmem:[%s5736_s8 + $0x330] sm:$0xff] %v4044_v53  ;;  %4428 = vst [vmem:[%s5736_s8 + $0x730] sm:$0xff] %v4172_v45  ;;  %v4045_v29 = vmax.f32 %v3789_v41, 0.0  ;;  %v4173_v5 = vmax.f32 %v3917_v51, 0.0  ;;  %v3790_v58 = vadd.f32 %v6499_v11, %v1768_v6  ;;  %v3918_v56 = vadd.f32 %v3629_v48, %v2088_v13  ;;  %v6503_v53 = vld [vmem:[#allocation27_spill] sm:$0xff]  ;;  %v3654_v13 = vpop.permute.xlu1 %3653 }
 0x1b9   : > { %v1770_v3 = vpop.f32.mrf.mxu0  ;;  %v2090_v9 = vpop.f32.mrf.mxu1 }
 0x1ba   : > { %4301 = vst [vmem:[%s5736_s8 + $0x338] sm:$0xff] %v4045_v29  ;;  %4429 = vst [vmem:[%s5736_s8 + $0x738] sm:$0xff] %v4173_v5  ;;  %v4046_v24 = vmax.f32 %v3790_v58, 0.0  ;;  %v4174_v16 = vmax.f32 %v3918_v56, 0.0  ;;  %v3791_v50 = vadd.f32 %v6499_v11, %v1770_v3  ;;  %v3919_v25 = vadd.f32 %v3629_v48, %v2090_v9 }
 0x1bb   : > { %v1772_v42 = vpop.f32.mrf.mxu0  ;;  %v2092_v27 = vpop.f32.mrf.mxu1 }
 0x1bc   : > { %4302 = vst [vmem:[%s5736_s8 + $0x340] sm:$0xff] %v4046_v24  ;;  %4430 = vst [vmem:[%s5736_s8 + $0x740] sm:$0xff] %v4174_v16  ;;  %v4047_v1 = vmax.f32 %v3791_v50, 0.0  ;;  %v4175_v26 = vmax.f32 %v3919_v25, 0.0  ;;  %v3792_v17 = vadd.f32 %v6500_v34, %v1772_v42  ;;  %v3920_v21 = vadd.f32 %v3634_v55, %v2092_v27  ;;  %v6504_v24 = vld [vmem:[#allocation26_spill] sm:$0xff]  ;;  %v3659_v27 = vpop.permute.xlu0 %3658 }
 0x1bd   : > { %v1774_v22 = vpop.f32.mrf.mxu0  ;;  %v2094_v28 = vpop.f32.mrf.mxu1 }
 0x1be   : > { %4303 = vst [vmem:[%s5736_s8 + $0x348] sm:$0xff] %v4047_v1  ;;  %4431 = vst [vmem:[%s5736_s8 + $0x748] sm:$0xff] %v4175_v26  ;;  %v4048_v57 = vmax.f32 %v3792_v17, 0.0  ;;  %v4176_v52 = vmax.f32 %v3920_v21, 0.0  ;;  %v3793_v49 = vadd.f32 %v6500_v34, %v1774_v22  ;;  %v3921_v20 = vadd.f32 %v3634_v55, %v2094_v28 }
 0x1bf   : > { %v1778_v37 = vpop.f32.mrf.mxu0  ;;  %v2098_v15 = vpop.f32.mrf.mxu1 }
 0x1c0   : > { %4304 = vst [vmem:[%s5736_s8 + $0x350] sm:$0xff] %v4048_v57  ;;  %4432 = vst [vmem:[%s5736_s8 + $0x750] sm:$0xff] %v4176_v52  ;;  %v4049_v7 = vmax.f32 %v3793_v49, 0.0  ;;  %v4177_v4 = vmax.f32 %v3921_v20, 0.0  ;;  %v3794_v33 = vadd.f32 %v6501_v23, %v1778_v37  ;;  %v3922_v31 = vadd.f32 %v3639_v43, %v2098_v15  ;;  %v6505_v57 = vld [vmem:[#allocation29_spill] sm:$0xff]  ;;  %v3664_v15 = vpop.permute.xlu1 %3663 }
 0x1c1   : > { %v1780_v8 = vpop.f32.mrf.mxu0  ;;  %v2100_v40 = vpop.f32.mrf.mxu1 }
 0x1c2   : > { %4305 = vst [vmem:[%s5736_s8 + $0x358] sm:$0xff] %v4049_v7  ;;  %4433 = vst [vmem:[%s5736_s8 + $0x758] sm:$0xff] %v4177_v4  ;;  %v4050_v47 = vmax.f32 %v3794_v33, 0.0  ;;  %v4178_v36 = vmax.f32 %v3922_v31, 0.0  ;;  %v3795_v60 = vadd.f32 %v6501_v23, %v1780_v8  ;;  %v3923_v14 = vadd.f32 %v3639_v43, %v2100_v40 }
 0x1c3   : > { %v1782_v35 = vpop.f32.mrf.mxu0  ;;  %v2102_v12 = vpop.f32.mrf.mxu1 }
 0x1c4   : > { %4306 = vst [vmem:[%s5736_s8 + $0x360] sm:$0xff] %v4050_v47  ;;  %4434 = vst [vmem:[%s5736_s8 + $0x760] sm:$0xff] %v4178_v36  ;;  %v4051_v10 = vmax.f32 %v3795_v60, 0.0  ;;  %v4179_v39 = vmax.f32 %v3923_v14, 0.0  ;;  %v3796_v38 = vadd.f32 %v6502_v18, %v1782_v35  ;;  %v3924_v44 = vadd.f32 %v3644_v61, %v2102_v12  ;;  %v6506_v47 = vld [vmem:[#allocation28_spill] sm:$0xff] }
 0x1c5   : > { %v1784_v62 = vpop.f32.mrf.mxu0  ;;  %v2104_v54 = vpop.f32.mrf.mxu1 }
 0x1c6   : > { %4307 = vst [vmem:[%s5736_s8 + $0x368] sm:$0xff] %v4051_v10  ;;  %4435 = vst [vmem:[%s5736_s8 + $0x768] sm:$0xff] %v4179_v39  ;;  %v4052_v19 = vmax.f32 %v3796_v38, 0.0  ;;  %v4180_v46 = vmax.f32 %v3924_v44, 0.0  ;;  %v3797_v59 = vadd.f32 %v6502_v18, %v1784_v62  ;;  %v3925_v63 = vadd.f32 %v3644_v61, %v2104_v54  ;;  %v3669_v44 = vpop.permute.xlu0 %3668 }
 0x1c7   : > { %v1788_v2 = vpop.f32.mrf.mxu0  ;;  %v2108_v32 = vpop.f32.mrf.mxu1 }
 0x1c8   : > { %4308 = vst [vmem:[%s5736_s8 + $0x370] sm:$0xff] %v4052_v19  ;;  %4436 = vst [vmem:[%s5736_s8 + $0x770] sm:$0xff] %v4180_v46  ;;  %v4053_v0 = vmax.f32 %v3797_v59, 0.0  ;;  %v4181_v48 = vmax.f32 %v3925_v63, 0.0  ;;  %v3798_v45 = vadd.f32 %v6503_v53, %v1788_v2  ;;  %v3926_v41 = vadd.f32 %v3649_v30, %v2108_v32 }
 0x1c9   : > { %v1790_v51 = vpop.f32.mrf.mxu0  ;;  %v2110_v6 = vpop.f32.mrf.mxu1 }
 0x1ca   : > { %4309 = vst [vmem:[%s5736_s8 + $0x378] sm:$0xff] %v4053_v0  ;;  %4437 = vst [vmem:[%s5736_s8 + $0x778] sm:$0xff] %v4181_v48  ;;  %v4054_v29 = vmax.f32 %v3798_v45, 0.0  ;;  %v4182_v5 = vmax.f32 %v3926_v41, 0.0  ;;  %v3799_v11 = vadd.f32 %v6503_v53, %v1790_v51  ;;  %v3927_v58 = vadd.f32 %v3649_v30, %v2110_v6  ;;  %v6507_v30 = vld [vmem:[#allocation31_spill] sm:$0xff]  ;;  %v3674_v41 = vpop.permute.xlu1 %3673  ;;  %v6508_v6 = vld [vmem:[#allocation30_spill] sm:$0xff] }
 0x1cb   : > { %v1792_v56 = vpop.f32.mrf.mxu0  ;;  %v2112_v3 = vpop.f32.mrf.mxu1 }
 0x1cc   : > { %4310 = vst [vmem:[%s5736_s8 + $0x380] sm:$0xff] %v4054_v29  ;;  %4438 = vst [vmem:[%s5736_s8 + $0x780] sm:$0xff] %v4182_v5  ;;  %v4055_v9 = vmax.f32 %v3799_v11, 0.0  ;;  %v4183_v55 = vmax.f32 %v3927_v58, 0.0  ;;  %v3800_v16 = vadd.f32 %v6504_v24, %v1792_v56  ;;  %v3928_v50 = vadd.f32 %v3654_v13, %v2112_v3 }
 0x1cd   : > { %v1794_v25 = vpop.f32.mrf.mxu0  ;;  %v2114_v42 = vpop.f32.mrf.mxu1 }
 0x1ce   : > { %4311 = vst [vmem:[%s5736_s8 + $0x388] sm:$0xff] %v4055_v9  ;;  %4439 = vst [vmem:[%s5736_s8 + $0x788] sm:$0xff] %v4183_v55  ;;  %v4056_v1 = vmax.f32 %v3800_v16, 0.0  ;;  %v4184_v26 = vmax.f32 %v3928_v50, 0.0  ;;  %v3801_v34 = vadd.f32 %v6504_v24, %v1794_v25  ;;  %v3929_v17 = vadd.f32 %v3654_v13, %v2114_v42  ;;  %v3679_v50 = vpop.permute.xlu0 %3678  ;;  %v6509_v42 = vld [vmem:[#allocation33_spill] sm:$0xff] }
 0x1cf   : > { %v1798_v21 = vpop.f32.mrf.mxu0  ;;  %v2118_v22 = vpop.f32.mrf.mxu1 }
 0x1d0   : > { %4312 = vst [vmem:[%s5736_s8 + $0x390] sm:$0xff] %v4056_v1  ;;  %4440 = vst [vmem:[%s5736_s8 + $0x790] sm:$0xff] %v4184_v26  ;;  %v4057_v28 = vmax.f32 %v3801_v34, 0.0  ;;  %v4185_v43 = vmax.f32 %v3929_v17, 0.0  ;;  %v3802_v52 = vadd.f32 %v6505_v57, %v1798_v21  ;;  %v3930_v49 = vadd.f32 %v3659_v27, %v2118_v22 }
 0x1d1   : > { %v1800_v20 = vpop.f32.mrf.mxu0  ;;  %v2120_v37 = vpop.f32.mrf.mxu1 }
 0x1d2   : > { %4313 = vst [vmem:[%s5736_s8 + $0x398] sm:$0xff] %v4057_v28  ;;  %4441 = vst [vmem:[%s5736_s8 + $0x798] sm:$0xff] %v4185_v43  ;;  %v4058_v7 = vmax.f32 %v3802_v52, 0.0  ;;  %v4186_v4 = vmax.f32 %v3930_v49, 0.0  ;;  %v3803_v23 = vadd.f32 %v6505_v57, %v1800_v20  ;;  %v3931_v33 = vadd.f32 %v3659_v27, %v2120_v37  ;;  %v3684_v49 = vpop.permute.xlu1 %3683  ;;  %v6510_v37 = vld [vmem:[#allocation32_spill] sm:$0xff] }
 0x1d3   : > { %v1802_v31 = vpop.f32.mrf.mxu0  ;;  %v2122_v8 = vpop.f32.mrf.mxu1 }
 0x1d4   : > { %4314 = vst [vmem:[%s5736_s8 + $0x3a0] sm:$0xff] %v4058_v7  ;;  %4442 = vst [vmem:[%s5736_s8 + $0x7a0] sm:$0xff] %v4186_v4  ;;  %v4059_v40 = vmax.f32 %v3803_v23, 0.0  ;;  %v4187_v61 = vmax.f32 %v3931_v33, 0.0  ;;  %v3804_v36 = vadd.f32 %v6506_v47, %v1802_v31  ;;  %v3932_v60 = vadd.f32 %v3664_v15, %v2122_v8 }
 0x1d5   : > { %v1804_v14 = vpop.f32.mrf.mxu0  ;;  %v2124_v35 = vpop.f32.mrf.mxu1 }
 0x1d6   : > { %4315 = vst [vmem:[%s5736_s8 + $0x3a8] sm:$0xff] %v4059_v40  ;;  %4443 = vst [vmem:[%s5736_s8 + $0x7a8] sm:$0xff] %v4187_v61  ;;  %v4060_v12 = vmax.f32 %v3804_v36, 0.0  ;;  %v4188_v10 = vmax.f32 %v3932_v60, 0.0  ;;  %v3805_v39 = vadd.f32 %v6506_v47, %v1804_v14  ;;  %v3933_v18 = vadd.f32 %v3664_v15, %v2124_v35 }
 0x1d7   : > { %v1808_v38 = vpop.f32.mrf.mxu0 }
 0x1d8   : > { %4316 = vst [vmem:[%s5736_s8 + $0x3b0] sm:$0xff] %v4060_v12  ;;  %4444 = vst [vmem:[%s5736_s8 + $0x7b0] sm:$0xff] %v4188_v10  ;;  %v4061_v62 = vmax.f32 %v3805_v39, 0.0  ;;  %v4189_v54 = vmax.f32 %v3933_v18, 0.0  ;;  %v3806_v19 = vadd.f32 %v6507_v30, %v1808_v38  ;;  %v2128_v46 = vpop.f32.mrf.mxu1 }
 0x1d9   : > { %v3934_v59 = vadd.f32 %v3669_v44, %v2128_v46  ;;  %v1810_v63 = vpop.f32.mrf.mxu0 }
 0x1da   : > { %4317 = vst [vmem:[%s5736_s8 + $0x3b8] sm:$0xff] %v4061_v62  ;;  %4445 = vst [vmem:[%s5736_s8 + $0x7b8] sm:$0xff] %v4189_v54  ;;  %v4062_v2 = vmax.f32 %v3806_v19, 0.0  ;;  %v3807_v32 = vadd.f32 %v6507_v30, %v1810_v63  ;;  %v2130_v0 = vpop.f32.mrf.mxu1 }
 0x1db   : > { %v4190_v48 = vmax.f32 %v3934_v59, 0.0  ;;  %v3935_v53 = vadd.f32 %v3669_v44, %v2130_v0  ;;  %v1812_v45 = vpop.f32.mrf.mxu0 }
 0x1dc   : > { %4318 = vst [vmem:[%s5736_s8 + $0x3c0] sm:$0xff] %v4062_v2  ;;  %v4063_v51 = vmax.f32 %v3807_v32, 0.0  ;;  %v3808_v13 = vadd.f32 %v6508_v6, %v1812_v45  ;;  %v2132_v29 = vpop.f32.mrf.mxu1 }
 0x1dd   : > { %4446 = vst [vmem:[%s5736_s8 + $0x7c0] sm:$0xff] %v4190_v48  ;;  %v4191_v5 = vmax.f32 %v3935_v53, 0.0  ;;  %v3936_v11 = vadd.f32 %v3674_v41, %v2132_v29  ;;  %v1814_v58 = vpop.f32.mrf.mxu0 }
 0x1de   : > { %4319 = vst [vmem:[%s5736_s8 + $0x3c8] sm:$0xff] %v4063_v51  ;;  %v4064_v56 = vmax.f32 %v3808_v13, 0.0  ;;  %v3809_v3 = vadd.f32 %v6508_v6, %v1814_v58  ;;  %v2134_v9 = vpop.f32.mrf.mxu1 }
 0x1df   : > { %4447 = vst [vmem:[%s5736_s8 + $0x7c8] sm:$0xff] %v4191_v5  ;;  %v4192_v55 = vmax.f32 %v3936_v11, 0.0  ;;  %v3937_v24 = vadd.f32 %v3674_v41, %v2134_v9  ;;  %v1818_v16 = vpop.f32.mrf.mxu0 }
 0x1e0   : > { %4320 = vst [vmem:[%s5736_s8 + $0x3d0] sm:$0xff] %v4064_v56  ;;  %v4065_v25 = vmax.f32 %v3809_v3, 0.0  ;;  %v3810_v27 = vadd.f32 %v6509_v42, %v1818_v16  ;;  %v2138_v1 = vpop.f32.mrf.mxu1 }
 0x1e1   : > { %4448 = vst [vmem:[%s5736_s8 + $0x7d0] sm:$0xff] %v4192_v55  ;;  %v4193_v26 = vmax.f32 %v3937_v24, 0.0  ;;  %v3938_v34 = vadd.f32 %v3679_v50, %v2138_v1  ;;  %v1820_v17 = vpop.f32.mrf.mxu0 }
 0x1e2   : > { %4321 = vst [vmem:[%s5736_s8 + $0x3d8] sm:$0xff] %v4065_v25  ;;  %v4066_v21 = vmax.f32 %v3810_v27, 0.0  ;;  %v3811_v22 = vadd.f32 %v6509_v42, %v1820_v17  ;;  %v2140_v28 = vpop.f32.mrf.mxu1 }
 0x1e3   : > { %4449 = vst [vmem:[%s5736_s8 + $0x7d8] sm:$0xff] %v4193_v26  ;;  %v4194_v43 = vmax.f32 %v3938_v34, 0.0  ;;  %v3939_v57 = vadd.f32 %v3679_v50, %v2140_v28  ;;  %v1822_v52 = vpop.f32.mrf.mxu0 }
 0x1e4   : > { %4322 = vst [vmem:[%s5736_s8 + $0x3e0] sm:$0xff] %v4066_v21  ;;  %v4067_v20 = vmax.f32 %v3811_v22, 0.0  ;;  %v3812_v15 = vadd.f32 %v6510_v37, %v1822_v52  ;;  %v2142_v7 = vpop.f32.mrf.mxu1 }
 0x1e5   : > { %4450 = vst [vmem:[%s5736_s8 + $0x7e0] sm:$0xff] %v4194_v43  ;;  %v4195_v4 = vmax.f32 %v3939_v57, 0.0  ;;  %v3940_v23 = vadd.f32 %v3684_v49, %v2142_v7  ;;  %v1824_v33 = vpop.f32.mrf.mxu0 }
 0x1e6   : > { %4323 = vst [vmem:[%s5736_s8 + $0x3e8] sm:$0xff] %v4067_v20  ;;  %v4068_v31 = vmax.f32 %v3812_v15, 0.0  ;;  %v3813_v8 = vadd.f32 %v6510_v37, %v1824_v33  ;;  %v2144_v40 = vpop.f32.mrf.mxu1 }
 0x1e7   : > { %4451 = vst [vmem:[%s5736_s8 + $0x7e8] sm:$0xff] %v4195_v4  ;;  %v4196_v61 = vmax.f32 %v3940_v23, 0.0  ;;  %v3941_v47 = vadd.f32 %v3684_v49, %v2144_v40 }
 0x1e8   : > { %4324 = vst [vmem:[%s5736_s8 + $0x3f0] sm:$0xff] %v4068_v31  ;;  %v4069_v36 = vmax.f32 %v3813_v8, 0.0 }
 0x1e9   : > { %4452 = vst [vmem:[%s5736_s8 + $0x7f0] sm:$0xff] %v4196_v61  ;;  %v4197_v60 = vmax.f32 %v3941_v47, 0.0 }
 0x1ea   : > { %4325 = vst [vmem:[%s5736_s8 + $0x3f8] sm:$0xff] %v4069_v36 }
 0x1eb   : > { %4453 = vst [vmem:[%s5736_s8 + $0x7f8] sm:$0xff] %v4197_v60 }
 0x1ec   : > { %4894 = shalt.err (!%p4891_p5)
}
 0x1ed   : > { %s4895_s6 = scalar_lea.hbm %s6364_s19, 32768  ;;  %s4899_s29 = scalar_lea.hbm %s6421_s3, 65536 }
 0x1ee   : > { %p4896_p6 = scmp.ne.s32.totalorder %s6364_s19, %s4895_s6  ;;  %p4900_p10 = scmp.lt.s32.totalorder %s6364_s19, %s6421_s3 }
 0x1ef   : > { %p4901_p11 = scmp.lt.s32.totalorder %s4899_s29, %s4895_s6 }
 0x1f0   : > { %p4897_p7 = pnand %p4896_p6, %p5023_p4 }
 0x1f1   : > { %p4902_p12 = por %p4901_p11, %p4900_p10 }
 0x1f2   : > { %p4898_p9 = pneg %p4897_p7 }
 0x1f4   : > { %p4903_p13 = pnand %p4902_p12, %p4898_p9 }
 0x1f6   : > { %4906 = shalt.err (!%p4903_p13)
}
 0x1f7   : > { %s4961_s5 = smov 256   ;;  %s4962_s7 = smov 16  }
 0x1f8   : > { %4752 = dma.vmem_to_hbm [thread:$0]  (%p5023_p4), %s6366_s10, 32768, %s6364_s19, %s6373_s15, %s4961_s5, %s4961_s5, %s4962_s7  }
 0x1f9 PF: > { %p4758_p0 = scmp.ge.s32.totalorder %s4957_s17, 2  ;;  %s4488_s9 = sand.u32 1, %s4937_s12  }
 0x1fa   : > { %s4489_s11 = scalar_lea.sflag [#allocation4], %s4488_s9 }
 0x1fb   : > { %p4755_p1 = pnand %p4758_p0, %p5030_p8 }
 0x1fd   : > { %p4756_p2 = pneg %p4755_p1 }
 0x1ff   : > { %4932 = dma.done.wait (%p4756_p2), %s4489_s11, 32768  }
 0x200   : > { %4934 = vsyncadd (%p4756_p2), %s4489_s11, 4294934528  ;;  %s16_s17 = sadd.s32 1, %s4957_s17   ;;  %s6511_s12 = smov %s4941_s13 }
 0x201   : > { %p13_p3 = scmp.ge.s32.totalorder %s16_s17, 4   ;;  %s6512_s13 = smov %s4945_s14 }
 0x202   : > { %s6513_s14 = smov %s5036_s25  ;;  %s6514_s15 = smov %s4953_s16 }
 0x203   : > { %s6515_s16 = smov %s6517_s20  ;;  %15 = sbr.rel (!%p13_p3) target bundleno = 4 (0x4), region = 81 }
 0x208   :  { %4494 = vsyncpa [#allocation4], 1 }
 0x209   :  { %4496 = vsyncpa [#allocation4 + $0x1], 1 }

</bundles_post_ra>
